<compile_context>
chip_gen: v6e
topology: v6e:2x2x1
jax: 0.10.0
libtpu: 0.0.40
codegen_flags: <defaults>
</compile_context>

<pallas_src>
import jax
import jax.numpy as jnp
from jax.experimental import pallas as pl
from jax.experimental.pallas import tpu as pltpu

EPS = 1e-5
LANE = 128


def _round_up(n, m):
    return ((n + m - 1) // m) * m


def _conv3x3_accum(p, w_ref, H, W, Cp):
    """3x3 'same' conv as 9 accumulated MXU matmuls (no materialized im2col slab).

    p: zero-padded bf16 activation value, shape (H+2, W+2, Cp).
    w_ref: weight ref, shape (9, Cp, Cp), leading index = 3*kh + kw.
    Returns f32 accumulator of shape (H*W, Cp).
    Note: K=Cp per matmul; if MXU-bound on v6e/v7x, group the 3 kw shifts per kh
    into a K=3*Cp contraction instead (v5e's 128-wide MXU is already full here).
    """
    acc = None
    for kh in range(3):
        for kw in range(3):
            sl = p[kh:kh + H, kw:kw + W, :].reshape(H * W, Cp)
            t = jnp.dot(sl, w_ref[3 * kh + kw], preferred_element_type=jnp.float32)
            acc = t if acc is None else acc + t
    return acc


# ---------------------------------------------------------------------------
# Pass 1: conv1 (3x3, pad=1) on spatially pre-padded x; raw z1 + per-sample moments.
# ---------------------------------------------------------------------------
def _conv1_kernel(xp_ref, w1_ref, z1_ref, stats_ref):
    _, Hp2, Wp2, Cp = xp_ref.shape
    H, W = Hp2 - 2, Wp2 - 2
    acc = _conv3x3_accum(xp_ref[0], w1_ref, H, W, Cp)
    z1_ref[...] = acc.reshape(1, H, W, Cp).astype(z1_ref.dtype)
    s = jnp.sum(acc, axis=0, keepdims=True)
    ss = jnp.sum(acc * acc, axis=0, keepdims=True)
    stats_ref[...] = jnp.concatenate([s, ss], axis=0).reshape(1, 2, Cp)


# ---------------------------------------------------------------------------
# Pass 2: bn1(affine)+relu -> conv2 (3x3); raw z2, per-sample bn2 moments, SE pool.
# ---------------------------------------------------------------------------
def _conv2_kernel(z1_ref, sc1_ref, sh1_ref, w2_ref, z2_ref, stats_ref, pool_ref, padbuf):
    _, H, W, Cp = z1_ref.shape
    # Re-zero the halo scratch EVERY step: scratch is per-core, so this keeps the
    # batch axis correct under "parallel" (v7x dual-TC). Full contiguous zero-fill
    # of the small bf16 buffer keeps lowering simple (ring-only would shave a few KB).
    padbuf[...] = jnp.zeros_like(padbuf)
    # bn1 with precomputed global scale/shift, relu in f32, single cast to bf16.
    a1 = jnp.maximum(z1_ref[0].astype(jnp.float32) * sc1_ref[...] + sh1_ref[...], 0.0)
    padbuf[1:H + 1, 1:W + 1, :] = a1.astype(padbuf.dtype)
    acc = _conv3x3_accum(padbuf[...], w2_ref, H, W, Cp)
    z2_ref[...] = acc.reshape(1, H, W, Cp).astype(z2_ref.dtype)
    s = jnp.sum(acc, axis=0, keepdims=True)          # reused: bn2 sum AND SE pool sum
    ss = jnp.sum(acc * acc, axis=0, keepdims=True)
    stats_ref[...] = jnp.concatenate([s, ss], axis=0).reshape(1, 2, Cp)
    pool_ref[...] = s.reshape(1, 1, Cp)


# ---------------------------------------------------------------------------
# SE head, batched over the whole batch in one call (weights loaded once, M = B).
# ---------------------------------------------------------------------------
def _se_head_kernel(pool_ref, sc2_ref, sh2_ref, wfc1_ref, wfc2_ref, wr_ref, br_ref,
                    y_ref, route_ref):
    # pool_ref holds the per-sample spatial MEAN of the raw conv2 output.
    pooled = pool_ref[...] * sc2_ref[...] + sh2_ref[...]          # bn2 of the mean
    h = jnp.maximum(jnp.dot(pooled, wfc1_ref[...],
                            preferred_element_type=jnp.float32), 0.0)
    logits = jnp.dot(h, wfc2_ref[...], preferred_element_type=jnp.float32)
    y = 1.0 / (1.0 + jnp.exp(-logits))                            # exact sigmoid
    y_ref[...] = y
    route_ref[...] = jnp.dot(y, wr_ref[...],
                             preferred_element_type=jnp.float32) + br_ref[...]


# ---------------------------------------------------------------------------
# Pass 3: bn2(affine) + SE channel scale + identity residual + relu (bf16 out).
# ---------------------------------------------------------------------------
def _finalize_kernel(z2_ref, x_ref, sc2_ref, sh2_ref, y_ref, out_ref):
    _, H, W, Cp = z2_ref.shape
    z2bn = z2_ref[0].astype(jnp.float32) * sc2_ref[...] + sh2_ref[...]
    out = jnp.maximum(z2bn * y_ref[0] + x_ref[0].astype(jnp.float32), 0.0)
    out_ref[...] = out.reshape(1, H, W, Cp).astype(out_ref.dtype)


# ---------------------------------------------------------------------------
# Wrapper
# ---------------------------------------------------------------------------
def _bn_scale_shift(stats, gamma, beta, n):
    # NOTE: E[x^2] - E[x]^2 in f32 over B*H*W rows; fine at current tolerances,
    # switch to a two-pass / Welford form if tolerances tighten or B*H*W grows.
    mean = stats[0] / n
    var = jnp.maximum(stats[1] / n - mean * mean, 0.0)
    scale = gamma * jax.lax.rsqrt(var + EPS)
    shift = beta - mean * scale
    return (scale.reshape(1, -1).astype(jnp.float32),
            shift.reshape(1, -1).astype(jnp.float32))


def init_params(key, inplanes, planes, reduction=16, num_classes_route=10):
    hidden = max(planes // reduction, 1)
    ks = jax.random.split(key, 10)

    def n(k, shape, scale):
        return scale * jax.random.normal(k, shape, jnp.float32)

    return {
        "conv1_w": n(ks[0], (planes, inplanes, 3, 3), 0.1),
        "bn1_g": 1.0 + n(ks[1], (planes,), 0.1),
        "bn1_b": n(ks[2], (planes,), 0.1),
        "conv2_w": n(ks[3], (planes, planes, 3, 3), 0.1),
        "bn2_g": 1.0 + n(ks[4], (planes,), 0.1),
        "bn2_b": n(ks[5], (planes,), 0.1),
        "fc1_w": n(ks[6], (hidden, planes), 0.3),
        "fc2_w": n(ks[7], (planes, hidden), 0.3),
        "route_w": n(ks[8], (num_classes_route, planes), 0.3),
        "route_b": n(ks[9], (num_classes_route,), 0.1),
    }


def se_basic_block_forward(xr, p):
    """xr = (x_nchw, sc, route_classifier_outs) -- mirrors the torch forward."""
    x_nchw, sc, route_outs = xr
    B, Cin, H, W = x_nchw.shape
    C = p["conv1_w"].shape[0]            # planes
    hidden = p["fc1_w"].shape[0]
    NC = p["route_w"].shape[0]
    assert Cin == C, "identity shortcut requires inplanes == planes (no downsample)"
    # TODO(synk): stride > 1 / downsample branch not implemented (module defaults).

    Cp = _round_up(C, LANE)
    Hp = _round_up(hidden, LANE)
    NCp = _round_up(NC, LANE)

    # NCHW -> NHWC (lane-dense channels), zero-pad channels, bf16 MXU operands.
    x = jnp.transpose(x_nchw, (0, 2, 3, 1)).astype(jnp.float32)
    x = jnp.pad(x, ((0, 0), (0, 0), (0, 0), (0, Cp - Cin))).astype(jnp.bfloat16)
    # One-time spatial pre-pad so pass 1 needs no halo scratch / interior copy.
    x_pad = jnp.pad(x, ((0, 0), (1, 1), (1, 1), (0, 0)))

    def conv_w(w_oihw):
        w = jnp.transpose(w_oihw, (2, 3, 1, 0))                   # (kh, kw, in, out)
        w = jnp.pad(w, ((0, 0), (0, 0),
                        (0, Cp - w.shape[2]), (0, Cp - w.shape[3])))
        return w.reshape(9, Cp, Cp).astype(jnp.bfloat16)

    w1 = conv_w(p["conv1_w"])
    w2 = conv_w(p["conv2_w"])
    g1 = jnp.pad(p["bn1_g"], (0, Cp - C), constant_values=1.0)
    b1 = jnp.pad(p["bn1_b"], (0, Cp - C))
    g2 = jnp.pad(p["bn2_g"], (0, Cp - C), constant_values=1.0)
    b2 = jnp.pad(p["bn2_b"], (0, Cp - C))
    wfc1 = jnp.pad(p["fc1_w"].T, ((0, Cp - C), (0, Hp - hidden))).astype(jnp.float32)
    wfc2 = jnp.pad(p["fc2_w"].T, ((0, Hp - hidden), (0, Cp - C))).astype(jnp.float32)
    wr = jnp.pad(p["route_w"].T, ((0, Cp - C), (0, NCp - NC))).astype(jnp.float32)
    br = jnp.pad(p["route_b"], (0, NCp - NC)).reshape(1, NCp).astype(jnp.float32)

    n_rows = float(B * H * W)

    act_spec = pl.BlockSpec((1, H, W, Cp), lambda b: (b, 0, 0, 0))
    xpad_spec = pl.BlockSpec((1, H + 2, W + 2, Cp), lambda b: (b, 0, 0, 0))
    w_spec = pl.BlockSpec((9, Cp, Cp), lambda b: (0, 0, 0))
    vec_spec = pl.BlockSpec((1, Cp), lambda b: (0, 0))
    stats_spec = pl.BlockSpec((1, 2, Cp), lambda b: (b, 0, 0))
    per_b_vec = pl.BlockSpec((1, 1, Cp), lambda b: (b, 0, 0))
    parallel = pltpu.CompilerParams(dimension_semantics=("parallel",))

    # ---- pass 1: conv1 + per-sample bn1 moments ---------------------------
    z1, stats1_b = pl.pallas_call(
        _conv1_kernel,
        grid=(B,),
        in_specs=[xpad_spec, w_spec],
        out_specs=(act_spec, stats_spec),
        out_shape=(jax.ShapeDtypeStruct((B, H, W, Cp), jnp.bfloat16),
                   jax.ShapeDtypeStruct((B, 2, Cp), jnp.float32)),
        compiler_params=parallel,
    )(x_pad, w1)

    sc1, sh1 = _bn_scale_shift(jnp.sum(stats1_b, axis=0), g1, b1, n_rows)

    # ---- pass 2: bn1+relu -> conv2, per-sample bn2 moments + SE pool sums --
    z2, stats2_b, pool = pl.pallas_call(
        _conv2_kernel,
        grid=(B,),
        in_specs=[act_spec, vec_spec, vec_spec, w_spec],
        out_specs=(act_spec, stats_spec, per_b_vec),
        out_shape=(jax.ShapeDtypeStruct((B, H, W, Cp), jnp.bfloat16),
                   jax.ShapeDtypeStruct((B, 2, Cp), jnp.float32),
                   jax.ShapeDtypeStruct((B, 1, Cp), jnp.float32)),
        scratch_shapes=[pltpu.VMEM((H + 2, W + 2, Cp), jnp.bfloat16)],
        compiler_params=parallel,
    )(z1, sc1, sh1, w2)

    sc2, sh2 = _bn_scale_shift(jnp.sum(stats2_b, axis=0), g2, b2, n_rows)

    # ---- SE head: one tiny batched call (fc1/relu/fc2/sigmoid/route) -------
    pool_mean = pool[:, 0, :] * (1.0 / (H * W))
    y_full, route_full = pl.pallas_call(
        _se_head_kernel,
        grid=(1,),
        in_specs=[pl.BlockSpec((B, Cp), lambda i: (0, 0)),
                  pl.BlockSpec((1, Cp), lambda i: (0, 0)),
                  pl.BlockSpec((1, Cp), lambda i: (0, 0)),
                  pl.BlockSpec((Cp, Hp), lambda i: (0, 0)),
                  pl.BlockSpec((Hp, Cp), lambda i: (0, 0)),
                  pl.BlockSpec((Cp, NCp), lambda i: (0, 0)),
                  pl.BlockSpec((1, NCp), lambda i: (0, 0))],
        out_specs=(pl.BlockSpec((B, Cp), lambda i: (0, 0)),
                   pl.BlockSpec((B, NCp), lambda i: (0, 0))),
        out_shape=(jax.ShapeDtypeStruct((B, Cp), jnp.float32),
                   jax.ShapeDtypeStruct((B, NCp), jnp.float32)),
    )(pool_mean, sc2, sh2, wfc1, wfc2, wr, br)

    # ---- pass 3: bn2 + SE channel scale + identity residual + relu ---------
    out = pl.pallas_call(
        _finalize_kernel,
        grid=(B,),
        in_specs=[act_spec, act_spec, vec_spec, vec_spec, per_b_vec],
        out_specs=act_spec,
        out_shape=jax.ShapeDtypeStruct((B, H, W, Cp), jnp.bfloat16),
        compiler_params=parallel,
    )(z2, x, sc2, sh2, y_full.reshape(B, 1, Cp))

    # Boundary conversion back to the torch NCHW convention (an NHWC-carrying
    # model would consume `out` directly and skip this relayout).
    out_nchw = jnp.transpose(out[..., :C], (0, 3, 1, 2)).astype(jnp.float32)
    y = y_full[:, :C]
    route = route_full[:, :NC]
    sc_new = jnp.concatenate([sc, y], axis=1)
    return out_nchw, sc_new, route_outs + [route]


# ---------------------------------------------------------------------------
# Pure-JAX (XLA, f32) reference replicating the torch forward in NCHW.
# ---------------------------------------------------------------------------
def reference_forward(xr, p):
    x, sc, routes = xr

    def conv(a, w):
        return jax.lax.conv_general_dilated(
            a, w, window_strides=(1, 1), padding=[(1, 1), (1, 1)],
            dimension_numbers=("NCHW", "OIHW", "NCHW"))

    def bn(a, g, b):
        mean = jnp.mean(a, axis=(0, 2, 3), keepdims=True)
        var = jnp.mean((a - mean) ** 2, axis=(0, 2, 3), keepdims=True)
        return ((a - mean) * jax.lax.rsqrt(var + EPS)
                * g[None, :, None, None] + b[None, :, None, None])

    out = jnp.maximum(bn(conv(x, p["conv1_w"]), p["bn1_g"], p["bn1_b"]), 0.0)
    out = bn(conv(out, p["conv2_w"]), p["bn2_g"], p["bn2_b"])

    pooled = jnp.mean(out, axis=(2, 3))
    h = jnp.maximum(pooled @ p["fc1_w"].T, 0.0)
    y = jax.nn.sigmoid(h @ p["fc2_w"].T)
    route = y @ p["route_w"].T + p["route_b"]

    out = jnp.maximum(out * y[:, :, None, None] + x, 0.0)
    sc_new = jnp.concatenate([sc, y], axis=1)
    return out, sc_new, routes + [route]


if __name__ == "__main__":
    key = jax.random.PRNGKey(0)
    B, H, W = 2, 16, 16
    planes = 64
    inplanes = planes                    # identity shortcut (expansion=1, stride=1)
    reduction = 16
    num_classes_route = 10

    params = init_params(key, inplanes, planes, reduction=reduction,
                         num_classes_route=num_classes_route)

    kx, ksc = jax.random.split(jax.random.fold_in(key, 99))
    x = jax.random.normal(kx, (B, inplanes, H, W), jnp.float32)
    sc_prev = jax.random.normal(ksc, (B, 4), jnp.float32)
    xr = (x, sc_prev, [])

    out, sc_new, route_outs = se_basic_block_forward(xr, params)
    jax.block_until_ready((out, sc_new, route_outs[0]))

    ref_out, ref_sc, ref_routes = reference_forward(xr, params)
    assert out.shape == (B, planes, H, W)
    assert sc_new.shape == (B, 4 + planes)
    assert route_outs[0].shape == (B, num_classes_route)
    # Kernel uses bf16 MXU operands / bf16 intermediates and a bf16 final output
    # vs an all-f32 reference, and both conv outputs go through batch norm
    # -> loose-ish tolerances.
    assert jnp.allclose(out, ref_out, atol=1e-1, rtol=1e-1), \
        float(jnp.max(jnp.abs(out - ref_out)))
    assert jnp.allclose(sc_new, ref_sc, atol=5e-2, rtol=5e-2), \
        float(jnp.max(jnp.abs(sc_new - ref_sc)))
    assert jnp.allclose(route_outs[0], ref_routes[0], atol=5e-2, rtol=5e-2), \
        float(jnp.max(jnp.abs(route_outs[0] - ref_routes[0])))

    print("KERNEL_OK")
</pallas_src>

<mosaic_0001>
module attributes {stable_mosaic.version = 11 : i64} {
  func.func @_conv1_kernel(%arg0: i32, %arg1: memref<1x18x18x128xbf16, #tpu.memory_space<vmem>>, %arg2: memref<9x128x128xbf16, #tpu.memory_space<vmem>>, %arg3: memref<1x16x16x128xbf16, #tpu.memory_space<vmem>>, %arg4: memref<1x2x128xf32, #tpu.memory_space<vmem>>) attributes {dimension_semantics = [#tpu.dimension_semantics<parallel>], iteration_bounds = array<i64: 2>, scalar_prefetch = 0 : i64, scratch_operands = 0 : i64, tpu.core_type = #tpu.core_type<tc>, window_params = [{transform_indices = @transform_0, window_bounds = array<i64: 1, 18, 18, 128>}, {pipeline_mode = #tpu.pipeline_mode<synchronous>, transform_indices = @transform_1, window_bounds = array<i64: 9, 128, 128>}, {transform_indices = @transform_2, window_bounds = array<i64: 1, 16, 16, 128>}, {transform_indices = @transform_3, window_bounds = array<i64: 1, 2, 128>}]} {
    %c0 = arith.constant 0 : index
    %c0_0 = arith.constant 0 : index
    %c0_1 = arith.constant 0 : index
    %c0_2 = arith.constant 0 : index
    %0 = vector.load %arg1[%c0, %c0_0, %c0_1, %c0_2] : memref<1x18x18x128xbf16, #tpu.memory_space<vmem>>, vector<1x18x18x128xbf16>
    %1 = vector.shape_cast %0 : vector<1x18x18x128xbf16> to vector<18x18x128xbf16>
    %2 = vector.extract_strided_slice %1 {offsets = [0, 0, 0], sizes = [16, 16, 128], strides = [1, 1, 1]} : vector<18x18x128xbf16> to vector<16x16x128xbf16>
    %3 = vector.shape_cast %2 : vector<16x16x128xbf16> to vector<256x128xbf16>
    %c0_3 = arith.constant 0 : index
    %c0_4 = arith.constant 0 : index
    %c0_5 = arith.constant 0 : index
    %4 = vector.load %arg2[%c0_3, %c0_4, %c0_5] : memref<9x128x128xbf16, #tpu.memory_space<vmem>>, vector<1x128x128xbf16>
    %5 = vector.shape_cast %4 : vector<1x128x128xbf16> to vector<128x128xbf16>
    %cst = arith.constant dense<0.000000e+00> : vector<256x128xf32>
    %6 = tpu.matmul %3, %5, %cst {dimension_numbers = #tpu.dot_dimension_numbers<[1], [0], [0], [1], [0, 0, 1, 1], [], []>} : vector<256x128xbf16>, vector<128x128xbf16>, vector<256x128xf32> -> vector<256x128xf32>
    %7 = vector.extract_strided_slice %1 {offsets = [0, 1, 0], sizes = [16, 16, 128], strides = [1, 1, 1]} : vector<18x18x128xbf16> to vector<16x16x128xbf16>
    %8 = vector.shape_cast %7 : vector<16x16x128xbf16> to vector<256x128xbf16>
    %c1 = arith.constant 1 : index
    %c0_6 = arith.constant 0 : index
    %c0_7 = arith.constant 0 : index
    %9 = vector.load %arg2[%c1, %c0_6, %c0_7] : memref<9x128x128xbf16, #tpu.memory_space<vmem>>, vector<1x128x128xbf16>
    %10 = vector.shape_cast %9 : vector<1x128x128xbf16> to vector<128x128xbf16>
    %cst_8 = arith.constant dense<0.000000e+00> : vector<256x128xf32>
    %11 = tpu.matmul %8, %10, %cst_8 {dimension_numbers = #tpu.dot_dimension_numbers<[1], [0], [0], [1], [0, 0, 1, 1], [], []>} : vector<256x128xbf16>, vector<128x128xbf16>, vector<256x128xf32> -> vector<256x128xf32>
    %12 = arith.addf %6, %11 : vector<256x128xf32>
    %13 = vector.extract_strided_slice %1 {offsets = [0, 2, 0], sizes = [16, 16, 128], strides = [1, 1, 1]} : vector<18x18x128xbf16> to vector<16x16x128xbf16>
    %14 = vector.shape_cast %13 : vector<16x16x128xbf16> to vector<256x128xbf16>
    %c2 = arith.constant 2 : index
    %c0_9 = arith.constant 0 : index
    %c0_10 = arith.constant 0 : index
    %15 = vector.load %arg2[%c2, %c0_9, %c0_10] : memref<9x128x128xbf16, #tpu.memory_space<vmem>>, vector<1x128x128xbf16>
    %16 = vector.shape_cast %15 : vector<1x128x128xbf16> to vector<128x128xbf16>
    %cst_11 = arith.constant dense<0.000000e+00> : vector<256x128xf32>
    %17 = tpu.matmul %14, %16, %cst_11 {dimension_numbers = #tpu.dot_dimension_numbers<[1], [0], [0], [1], [0, 0, 1, 1], [], []>} : vector<256x128xbf16>, vector<128x128xbf16>, vector<256x128xf32> -> vector<256x128xf32>
    %18 = arith.addf %12, %17 : vector<256x128xf32>
    %19 = vector.extract_strided_slice %1 {offsets = [1, 0, 0], sizes = [16, 16, 128], strides = [1, 1, 1]} : vector<18x18x128xbf16> to vector<16x16x128xbf16>
    %20 = vector.shape_cast %19 : vector<16x16x128xbf16> to vector<256x128xbf16>
    %c3 = arith.constant 3 : index
    %c0_12 = arith.constant 0 : index
    %c0_13 = arith.constant 0 : index
    %21 = vector.load %arg2[%c3, %c0_12, %c0_13] : memref<9x128x128xbf16, #tpu.memory_space<vmem>>, vector<1x128x128xbf16>
    %22 = vector.shape_cast %21 : vector<1x128x128xbf16> to vector<128x128xbf16>
    %cst_14 = arith.constant dense<0.000000e+00> : vector<256x128xf32>
    %23 = tpu.matmul %20, %22, %cst_14 {dimension_numbers = #tpu.dot_dimension_numbers<[1], [0], [0], [1], [0, 0, 1, 1], [], []>} : vector<256x128xbf16>, vector<128x128xbf16>, vector<256x128xf32> -> vector<256x128xf32>
    %24 = arith.addf %18, %23 : vector<256x128xf32>
    %25 = vector.extract_strided_slice %1 {offsets = [1, 1, 0], sizes = [16, 16, 128], strides = [1, 1, 1]} : vector<18x18x128xbf16> to vector<16x16x128xbf16>
    %26 = vector.shape_cast %25 : vector<16x16x128xbf16> to vector<256x128xbf16>
    %c4 = arith.constant 4 : index
    %c0_15 = arith.constant 0 : index
    %c0_16 = arith.constant 0 : index
    %27 = vector.load %arg2[%c4, %c0_15, %c0_16] : memref<9x128x128xbf16, #tpu.memory_space<vmem>>, vector<1x128x128xbf16>
    %28 = vector.shape_cast %27 : vector<1x128x128xbf16> to vector<128x128xbf16>
    %cst_17 = arith.constant dense<0.000000e+00> : vector<256x128xf32>
    %29 = tpu.matmul %26, %28, %cst_17 {dimension_numbers = #tpu.dot_dimension_numbers<[1], [0], [0], [1], [0, 0, 1, 1], [], []>} : vector<256x128xbf16>, vector<128x128xbf16>, vector<256x128xf32> -> vector<256x128xf32>
    %30 = arith.addf %24, %29 : vector<256x128xf32>
    %31 = vector.extract_strided_slice %1 {offsets = [1, 2, 0], sizes = [16, 16, 128], strides = [1, 1, 1]} : vector<18x18x128xbf16> to vector<16x16x128xbf16>
    %32 = vector.shape_cast %31 : vector<16x16x128xbf16> to vector<256x128xbf16>
    %c5 = arith.constant 5 : index
    %c0_18 = arith.constant 0 : index
    %c0_19 = arith.constant 0 : index
    %33 = vector.load %arg2[%c5, %c0_18, %c0_19] : memref<9x128x128xbf16, #tpu.memory_space<vmem>>, vector<1x128x128xbf16>
    %34 = vector.shape_cast %33 : vector<1x128x128xbf16> to vector<128x128xbf16>
    %cst_20 = arith.constant dense<0.000000e+00> : vector<256x128xf32>
    %35 = tpu.matmul %32, %34, %cst_20 {dimension_numbers = #tpu.dot_dimension_numbers<[1], [0], [0], [1], [0, 0, 1, 1], [], []>} : vector<256x128xbf16>, vector<128x128xbf16>, vector<256x128xf32> -> vector<256x128xf32>
    %36 = arith.addf %30, %35 : vector<256x128xf32>
    %37 = vector.extract_strided_slice %1 {offsets = [2, 0, 0], sizes = [16, 16, 128], strides = [1, 1, 1]} : vector<18x18x128xbf16> to vector<16x16x128xbf16>
    %38 = vector.shape_cast %37 : vector<16x16x128xbf16> to vector<256x128xbf16>
    %c6 = arith.constant 6 : index
    %c0_21 = arith.constant 0 : index
    %c0_22 = arith.constant 0 : index
    %39 = vector.load %arg2[%c6, %c0_21, %c0_22] : memref<9x128x128xbf16, #tpu.memory_space<vmem>>, vector<1x128x128xbf16>
    %40 = vector.shape_cast %39 : vector<1x128x128xbf16> to vector<128x128xbf16>
    %cst_23 = arith.constant dense<0.000000e+00> : vector<256x128xf32>
    %41 = tpu.matmul %38, %40, %cst_23 {dimension_numbers = #tpu.dot_dimension_numbers<[1], [0], [0], [1], [0, 0, 1, 1], [], []>} : vector<256x128xbf16>, vector<128x128xbf16>, vector<256x128xf32> -> vector<256x128xf32>
    %42 = arith.addf %36, %41 : vector<256x128xf32>
    %43 = vector.extract_strided_slice %1 {offsets = [2, 1, 0], sizes = [16, 16, 128], strides = [1, 1, 1]} : vector<18x18x128xbf16> to vector<16x16x128xbf16>
    %44 = vector.shape_cast %43 : vector<16x16x128xbf16> to vector<256x128xbf16>
    %c7 = arith.constant 7 : index
    %c0_24 = arith.constant 0 : index
    %c0_25 = arith.constant 0 : index
    %45 = vector.load %arg2[%c7, %c0_24, %c0_25] : memref<9x128x128xbf16, #tpu.memory_space<vmem>>, vector<1x128x128xbf16>
    %46 = vector.shape_cast %45 : vector<1x128x128xbf16> to vector<128x128xbf16>
    %cst_26 = arith.constant dense<0.000000e+00> : vector<256x128xf32>
    %47 = tpu.matmul %44, %46, %cst_26 {dimension_numbers = #tpu.dot_dimension_numbers<[1], [0], [0], [1], [0, 0, 1, 1], [], []>} : vector<256x128xbf16>, vector<128x128xbf16>, vector<256x128xf32> -> vector<256x128xf32>
    %48 = arith.addf %42, %47 : vector<256x128xf32>
    %49 = vector.extract_strided_slice %1 {offsets = [2, 2, 0], sizes = [16, 16, 128], strides = [1, 1, 1]} : vector<18x18x128xbf16> to vector<16x16x128xbf16>
    %50 = vector.shape_cast %49 : vector<16x16x128xbf16> to vector<256x128xbf16>
    %c8 = arith.constant 8 : index
    %c0_27 = arith.constant 0 : index
    %c0_28 = arith.constant 0 : index
    %51 = vector.load %arg2[%c8, %c0_27, %c0_28] : memref<9x128x128xbf16, #tpu.memory_space<vmem>>, vector<1x128x128xbf16>
    %52 = vector.shape_cast %51 : vector<1x128x128xbf16> to vector<128x128xbf16>
    %cst_29 = arith.constant dense<0.000000e+00> : vector<256x128xf32>
    %53 = tpu.matmul %50, %52, %cst_29 {dimension_numbers = #tpu.dot_dimension_numbers<[1], [0], [0], [1], [0, 0, 1, 1], [], []>} : vector<256x128xbf16>, vector<128x128xbf16>, vector<256x128xf32> -> vector<256x128xf32>
    %54 = arith.addf %48, %53 : vector<256x128xf32>
    %55 = vector.shape_cast %54 : vector<256x128xf32> to vector<1x16x16x128xf32>
    %56 = arith.truncf %55 : vector<1x16x16x128xf32> to vector<1x16x16x128xbf16>
    %c0_30 = arith.constant 0 : index
    %c0_31 = arith.constant 0 : index
    %c0_32 = arith.constant 0 : index
    %c0_33 = arith.constant 0 : index
    %57 = vector.load %arg3[%c0_30, %c0_31, %c0_32, %c0_33] : memref<1x16x16x128xbf16, #tpu.memory_space<vmem>>, vector<1x16x16x128xbf16>
    tpu.vector_store %arg3[%c0_30, %c0_31, %c0_32, %c0_33], %56 {strides = array<i32>} : memref<1x16x16x128xbf16, #tpu.memory_space<vmem>>, vector<1x16x16x128xbf16>,
    %cst_34 = arith.constant dense<0.000000e+00> : vector<128xf32>
    %58 = vector.multi_reduction <add>, %54, %cst_34 [0] : vector<256x128xf32> to vector<128xf32>
    %59 = vector.shape_cast %58 : vector<128xf32> to vector<1x128xf32>
    %60 = arith.mulf %54, %54 : vector<256x128xf32>
    %cst_35 = arith.constant dense<0.000000e+00> : vector<128xf32>
    %61 = vector.multi_reduction <add>, %60, %cst_35 [0] : vector<256x128xf32> to vector<128xf32>
    %62 = vector.shape_cast %61 : vector<128xf32> to vector<1x128xf32>
    %63 = tpu.concatenate %59, %62 in 0 : vector<1x128xf32>, vector<1x128xf32> -> vector<2x128xf32>
    %64 = vector.shape_cast %63 : vector<2x128xf32> to vector<1x2x128xf32>
    %c0_36 = arith.constant 0 : index
    %c0_37 = arith.constant 0 : index
    %c0_38 = arith.constant 0 : index
    %65 = vector.load %arg4[%c0_36, %c0_37, %c0_38] : memref<1x2x128xf32, #tpu.memory_space<vmem>>, vector<1x2x128xf32>
    tpu.vector_store %arg4[%c0_36, %c0_37, %c0_38], %64 {strides = array<i32>} : memref<1x2x128xf32, #tpu.memory_space<vmem>>, vector<1x2x128xf32>,
    return
  }
  func.func @transform_0(%arg0: i32) -> (i32, i32, i32, i32) {
    %c0_i32 = arith.constant 0 : i32
    %c0_i32_0 = arith.constant 0 : i32
    %c0_i32_1 = arith.constant 0 : i32
    %c0_i32_2 = arith.constant 0 : i32
    return %arg0, %c0_i32, %c0_i32_0, %c0_i32_1 : i32, i32, i32, i32
  }
  func.func @transform_1(%arg0: i32) -> (i32, i32, i32) {
    %c0_i32 = arith.constant 0 : i32
    %c0_i32_0 = arith.constant 0 : i32
    %c0_i32_1 = arith.constant 0 : i32
    %c0_i32_2 = arith.constant 0 : i32
    return %c0_i32, %c0_i32_0, %c0_i32_1 : i32, i32, i32
  }
  func.func @transform_2(%arg0: i32) -> (i32, i32, i32, i32) {
    %c0_i32 = arith.constant 0 : i32
    %c0_i32_0 = arith.constant 0 : i32
    %c0_i32_1 = arith.constant 0 : i32
    %c0_i32_2 = arith.constant 0 : i32
    return %arg0, %c0_i32, %c0_i32_0, %c0_i32_1 : i32, i32, i32, i32
  }
  func.func @transform_3(%arg0: i32) -> (i32, i32, i32) {
    %c0_i32 = arith.constant 0 : i32
    %c0_i32_0 = arith.constant 0 : i32
    %c0_i32_1 = arith.constant 0 : i32
    return %arg0, %c0_i32, %c0_i32_0 : i32, i32, i32
  }
}

</mosaic_0001>

<bundles_post_ra>
// kernel: tpu_custom_call.1
= control target key start
LH: loop header
LB: loop body
LE: loop exit
PB: predicated region body
PF: predicated region fallthrough
CT: control target
= control target key end

     0   :  { %9 = vsyncpa [#allocation3], 0  ;;  %s6641_s0 = inlined_call_operand.vmem [shape: bf16[2,18,18,128], index: 0, kind: input, shape index: {}]   ;;  %s6642_s1 = inlined_call_operand.vmem [shape: bf16[9,128,128], index: 1, kind: input, shape index: {}]   ;;  %s6643_s2 = inlined_call_operand.hbm [shape: bf16[2,16,16,128], index: 2, kind: output, shape index: {0}]   ;;  %s6644_s3 = inlined_call_operand.hbm [shape: f32[2,2,128], index: 3, kind: output, shape index: {1}]  }
   0x1   :  { %11 = vsyncpa [#allocation3 + $0x1], 0 }
   0x2   :  { %12 = vsyncpa [#allocation5], 0 }
   0x3   :  { %14 = vsyncpa [#allocation5 + $0x1], 0  ;;  %s5093_s12 = smov 0   ;;  %s5095_s13 = smov 0  }
   0x4   :  { %s5097_s14 = smov 0   ;;  %s5099_s15 = smov 0  }
   0x5 LB: > { %s5114_s16 = sadd.s32 4294967295, %s5067_s15   ;;  %s3721_s17 = sadd.s32 4294967294, %s5067_s15   ;;  %s5067_s15 = sphi %s5099_s15, %s6806_s15   ;;  %s5063_s14 = sphi %s5097_s14, %s6805_s14   ;;  %s5059_s13 = sphi %s5095_s13, %s6804_s13   ;;  %s5055_s12 = sphi %s5093_s12, %s6803_s12  }
   0x6   : > { %s5118_s18 = sadd.s32 1, %s5067_s15   ;;  %s74_s19 = sadd.s32 1, %s5063_s14 }
   0x7   : > { %s71_s20 = ssub.s32 %s5067_s15, %s5118_s18  ;;  %p84_p0 = scmp.ne.s32.totalorder %s5063_s14, %s5059_s13 }
   0x8   : > { %p72_p1 = scmp.eq.s32.totalorder %s71_s20, 0  ;;  %p85_p2 = scmp.eq.s32.totalorder %s5114_s16, 1 }
   0x9   : > { %p90_p3 = scmp.ne.s32.totalorder %s5059_s13, %s5055_s12  ;;  %p91_p4 = scmp.eq.s32.totalorder %s3721_s17, 1 }
   0xa   : > { %s5129_s21 = scalar_select %p72_p1, %s5063_s14, %s74_s19  }
   0xb   : > { %p5131_p5 = por %p85_p2, %p84_p0  ;;  %p5135_p6 = por %p91_p4, %p90_p3 }
   0xc   : > { %p3724_p7 = scmp.ge.s32.totalorder %s5067_s15, 1  ;;  %p146_p8 = scmp.lt.s32.totalorder %s5067_s15, 3 }
   0xe   : > { %p147_p9 = pnand %p3724_p7, %p146_p8 }
  0x10   : > { %150 = sbr.rel (%p147_p9) target bundleno = 608 (0x260), region = 28 }
  0x15   : > { %v4878_v0 = vld [vmem:[%s6642_s1 + $0x78] sm:$0xff]   ;;  %p175_p10 = scmp.lt.s32.totalorder %s5114_s16, 1  ;;  %v4879_v1 = vld [vmem:[%s6642_s1 + $0x70] sm:$0xff]   ;;  %v4880_v2 = vld [vmem:[%s6642_s1 + $0x68] sm:$0xff]   ;;  %vm251_vm0 = vsmask.f32 3328 }
  0x16   : > { %4383 = vmatprep.subr.bf16.mxu0 %v4878_v0  ;;  %4815 = vmatprep.subr.bf16.mxu1 %v4878_v0  ;;  %v4881_v3 = vld [vmem:[%s6642_s1 + $0x60] sm:$0xff]   ;;  %vm252_vm1 = vsmask.f32 7440  ;;  %v4882_v9 = vld [vmem:[%s6642_s1 + $0x58] sm:$0xff]   ;;  %v4883_v28 = vld [vmem:[%s6642_s1 + $0x50] sm:$0xff]   ;;  %v6683_v29 = vmov 0 }
  0x17   : > { %s176_s28 = scalar_select %p175_p10, %s5114_s16, 1  ;;  %4384 = vmatpush3.bf16.msra.mxu0 %v4878_v0  ;;  %4823 = vmatpush3.bf16.msra.mxu1 %v4878_v0  ;;  %vm5189_vm2 = vmor %vm251_vm0, %vm252_vm1  ;;  %v4884_v59 = vld [vmem:[%s6642_s1 + $0x48] sm:$0xff]   ;;  %vm1249_vm3 = vcmask 1042432   ;;  %vm1250_vm4 = vcmask 1046532  }
  0x18   : > { %4385 = vmatprep.subr.bf16.mxu0 %v4879_v1  ;;  %4816 = vmatprep.subr.bf16.mxu1 %v4879_v1  ;;  %v6684_v29 = vsel %vm5189_vm2, 4294967295, %v6683_v29  ;;  %vm5535_vm5 = vmor %vm1249_vm3, %vm1250_vm4  ;;  %s4071_s17 = sshll.u32 %s5114_s16, 11 }
  0x19   : > { %s4831_s4 = smul.u32 216, %s176_s28  ;;  %6685 = vst [vmem:[#allocation8_spill] sm:$0xff] %v6684_v29  ;;  %s6571_s25 = scalar_lea.hbm %s6643_s2, %s4071_s17 }
  0x1a   : > { %s5069_s28 = smov [#allocation2]  }
  0x1b   : > { %s5155_s7 = scalar_lea.vmem %s6641_s0, %s4831_s4  ;;  %4386 = vmatpush3.bf16.msra.mxu0 %v4879_v1  ;;  %4824 = vmatpush3.bf16.msra.mxu1 %v4879_v1  ;;  %s4981_s29 = sshll.u32 %s5069_s28, 4  ;;  %s4982_s29 = int_to_ptr.vmem [resolvable:$false] %s4981_s29 }
  0x1c   : > { %4387 = vmatprep.subr.bf16.mxu0 %v4880_v2  ;;  %4817 = vmatprep.subr.bf16.mxu1 %v4880_v2  ;;  %v5161_v4 = vld [vmem:[%s5155_s7] sm:$0xf]  ;;  %v5164_v5 = vld [vmem:[%s5155_s7 + $0x4] sm:$0xf]  ;;  %v5167_v6 = vld [vmem:[%s5155_s7 + $0x8] sm:$0x1] }
  0x1d   : > { %v255_v7 = vshrl.u32 %v5161_v4, 16  ;;  %v258_v8 = vshll.u32 %v5161_v4, 16  ;;  %v264_v10 = vshll.u32 %v5164_v5, 16  ;;  %v268_v11 = vshrl.u32 %v5164_v5, 16  ;;  %v205_v14 = vld [vmem:[%s5155_s7 + $0x60] sm:$0xf] }
  0x1e   : > { %v274_v12 = vshll.u32 %v5167_v6, 16  ;;  %v206_v17 = vld [vmem:[%s5155_s7 + $0x64] sm:$0xf]  ;;  %v207_v18 = vld [vmem:[%s5155_s7 + $0x68] sm:$0x1]  ;;  %v447_v22 = vshrl.u32 %v205_v14, 16 }
  0x1f   : > { %4388 = vmatpush3.bf16.msra.mxu0 %v4880_v2  ;;  %4825 = vmatpush3.bf16.msra.mxu1 %v4880_v2  ;;  %v257_v15 = vrot.slane %v255_v7, 4  ;;  %v260_v16 = vrot.slane %v258_v8, 5  ;;  %v266_v19 = vrot.slane %v264_v10, 5  ;;  %v270_v20 = vrot.slane %v268_v11, 4  ;;  %v5182_v23 = vld [vmem:[%s5155_s7 + $0xc] sm:$0xf] }
  0x20   : > { %4389 = vmatprep.subr.bf16.mxu0 %v4881_v3  ;;  %4818 = vmatprep.subr.bf16.mxu1 %v4881_v3  ;;  %v276_v21 = vrot.slane %v274_v12, 5  ;;  %v450_v25 = vshll.u32 %v205_v14, 16  ;;  %v456_v26 = vshll.u32 %v206_v17, 16  ;;  %v460_v27 = vshrl.u32 %v206_v17, 16  ;;  %v5194_v33 = vld [vmem:[%s5155_s7 + $0x10] sm:$0xf] }
  0x21   : > { %v261_v24 = vor.u32 %v260_v16, %v257_v15  ;;  %v271_v30 = vor.u32 %v270_v20, %v266_v19  ;;  %v449_v31 = vrot.slane %v447_v22, 4  ;;  %v466_v32 = vshll.u32 %v207_v18, 16  ;;  %v5198_v39 = vld [vmem:[%s5155_s7 + $0x14] sm:$0x1]  ;;  %v208_v44 = vld [vmem:[%s5155_s7 + $0x6c] sm:$0xf] }
  0x22   : > { %v279_v34 = vshrl.u32 %v5182_v23, 16  ;;  %v452_v36 = vrot.slane %v450_v25, 5  ;;  %v458_v37 = vrot.slane %v456_v26, 5  ;;  %v462_v38 = vrot.slane %v460_v27, 4  ;;  %v209_v49 = vld [vmem:[%s5155_s7 + $0x70] sm:$0xf] }
  0x23   : > { %4390 = vmatpush3.bf16.msra.mxu0 %v4881_v3  ;;  %4826 = vmatpush3.bf16.msra.mxu1 %v4881_v3  ;;  %v262_v35 = vrot.slane %v261_v24, 4  ;;  %v272_v40 = vrot.slane %v271_v30, 4  ;;  %v468_v41 = vrot.slane %v466_v32, 5  ;;  %v282_v43 = vshll.u32 %v5182_v23, 16  ;;  %v210_v54 = vld [vmem:[%s5155_s7 + $0x74] sm:$0x1] }
  0x24   : > { %4391 = vmatprep.subr.bf16.mxu0 %v4882_v9  ;;  %4819 = vmatprep.subr.bf16.mxu1 %v4882_v9  ;;  %v281_v42 = vrot.slane %v279_v34, 4  ;;  %v453_v46 = vor.u32 %v452_v36, %v449_v31  ;;  %v463_v47 = vor.u32 %v462_v38, %v458_v37  ;;  %v288_v48 = vshll.u32 %v5194_v33, 16  ;;  %v5222_v16 = vld [vmem:[%s5155_s7 + $0x18] sm:$0xf]  ;;  %v4885_v17 = vld [vmem:[%s6642_s1 + $0x40] sm:$0xff]   ;;  %s4983_s30 = scalar_lea.vmem %s4982_s29, 4096 }
  0x25   : > { %v267_v45 = vsel %vm5189_vm2, %v262_v35, %v266_v19  ;;  %v277_v50 = vsel %vm5189_vm2, %v272_v40, %v276_v21  ;;  %v284_v51 = vrot.slane %v282_v43, 5  ;;  %v292_v52 = vshrl.u32 %v5194_v33, 16  ;;  %v5230_v21 = vld [vmem:[%s5155_s7 + $0x1c] sm:$0xf]  ;;  %v5238_v27 = vld [vmem:[%s5155_s7 + $0x20] sm:$0x1] }
  0x26   : > { %v298_v53 = vshll.u32 %v5198_v39, 16  ;;  %v3744_v55 = vcombine.low %v267_v45, %v277_v50  ;;  %v454_v56 = vrot.slane %v453_v46, 4  ;;  %v464_v57 = vrot.slane %v463_v47, 4  ;;  %v211_v35 = vld [vmem:[%s5155_s7 + $0x78] sm:$0xf] }
  0x27   : > { %4392 = vmatpush3.bf16.msra.mxu0 %v4882_v9  ;;  %4827 = vmatpush3.bf16.msra.mxu1 %v4882_v9  ;;  %v290_v58 = vrot.slane %v288_v48, 5  ;;  %v285_v60 = vor.u32 %v284_v51, %v281_v42  ;;  %v294_v61 = vrot.slane %v292_v52, 4  ;;  %v471_v2 = vshrl.u32 %v208_v44, 16  ;;  %v4886_v42 = vld [vmem:[%s6642_s1 + $0x38] sm:$0xff]  }
  0x28   : > { %4393 = vmatprep.subr.bf16.mxu0 %v4883_v28  ;;  %4820 = vmatprep.subr.bf16.mxu1 %v4883_v28  ;;  %v300_v62 = vrot.slane %v298_v53, 5  ;;  %v459_v0 = vsel %vm5189_vm2, %v454_v56, %v458_v37  ;;  %v469_v1 = vsel %vm5189_vm2, %v464_v57, %v468_v41  ;;  %v474_v3 = vshll.u32 %v208_v44, 16  ;;  %v5250_v41 = vld [vmem:[%s5155_s7 + $0x7c] sm:$0xf]  ;;  %v5264_v57 = vld [vmem:[%s5155_s7 + $0x24] sm:$0xf] }
  0x29   : > { %4399 = vmatprep.mubr.bf16.mxu0 %v3744_v55  ;;  %v5219_v7 = vcombine.low %v459_v0, %v469_v1  ;;  %v286_v8 = vrot.slane %v285_v60, 4  ;;  %v295_v9 = vor.u32 %v294_v61, %v290_v58  ;;  %v480_v10 = vshll.u32 %v209_v49, 16  ;;  %v4887_v43 = vld [vmem:[%s6642_s1 + $0xb8] sm:$0xff]   ;;  %v213_v55 = vld [vmem:[%s5155_s7 + $0x80] sm:$0x1] }
  0x2a   : > { %v473_v11 = vrot.slane %v471_v2, 4  ;;  %v476_v12 = vrot.slane %v474_v3, 5  ;;  %v484_v14 = vshrl.u32 %v209_v49, 16  ;;  %v490_v15 = vshll.u32 %v210_v54, 16  ;;  %v5273_v0 = vld [vmem:[%s5155_s7 + $0x28] sm:$0xf] }
  0x2b   : > { %6686 = vst [vmem:[#allocation9_spill] sm:$0xff] %v5219_v7  ;;  %4394 = vmatpush3.bf16.msra.mxu0 %v4883_v28  ;;  %4828 = vmatpush3.bf16.msra.mxu1 %v4883_v28  ;;  %v291_v18 = vsel %vm5189_vm2, %v286_v8, %v290_v58  ;;  %v296_v19 = vrot.slane %v295_v9, 4  ;;  %v482_v20 = vrot.slane %v480_v10, 5  ;;  %v5234_v22 = vcombine.low %v5182_v23, %v5194_v33  ;;  %v4889_v2 = vld [vmem:[%s6642_s1 + $0xb0] sm:$0xff]   ;;  %v5281_v10 = vld [vmem:[%s5155_s7 + $0x2c] sm:$0x1] }
  0x2c   : > { %4395 = vmatprep.subr.bf16.mxu0 %v4884_v59  ;;  %4821 = vmatprep.subr.bf16.mxu1 %v4884_v59  ;;  %v477_v24 = vor.u32 %v476_v12, %v473_v11  ;;  %v486_v25 = vrot.slane %v484_v14, 4  ;;  %v492_v26 = vrot.slane %v490_v15, 5  ;;  %v303_v28 = vshrl.u32 %v5222_v16, 16  ;;  %v5284_v11 = vld [vmem:[%s5155_s7 + $0x84] sm:$0xf] }
  0x2d   : > { %4415 = vmatprep.mubr.bf16.mxu1 %v5219_v7  ;;  %v301_v30 = vsel %vm5189_vm2, %v296_v19, %v300_v62  ;;  %v306_v31 = vshll.u32 %v5222_v16, 16  ;;  %v312_v32 = vshll.u32 %v5230_v21, 16  ;;  %v316_v34 = vshrl.u32 %v5230_v21, 16 }
  0x2e   : > { %v5247_v36 = vcombine.low %v291_v18, %v301_v30  ;;  %v478_v37 = vrot.slane %v477_v24, 4  ;;  %v487_v38 = vor.u32 %v486_v25, %v482_v20  ;;  %v305_v40 = vrot.slane %v303_v28, 4  ;;  %v5288_v18 = vld [vmem:[%s5155_s7 + $0x88] sm:$0xf] }
  0x2f   : > { %4396 = vmatpush3.bf16.msra.mxu0 %v4884_v59  ;;  %4829 = vmatpush3.bf16.msra.mxu1 %v4884_v59  ;;  %v308_v44 = vrot.slane %v306_v31, 5  ;;  %v314_v45 = vrot.slane %v312_v32, 5  ;;  %v318_v46 = vrot.slane %v316_v34, 4  ;;  %v322_v47 = vshll.u32 %v5238_v27, 16  ;;  %v4888_v59 = vld [vmem:[%s6642_s1 + $0x30] sm:$0xff]   ;;  %v4891_v28 = vld [vmem:[%s6642_s1 + $0xa8] sm:$0xff]  }
  0x30   : > { %6687 = vst [vmem:[#allocation10_spill] sm:$0xff] %v5247_v36  ;;  %4397 = vmatprep.subr.bf16.mxu0 %v4885_v17  ;;  %4822 = vmatprep.subr.bf16.mxu1 %v4885_v17  ;;  %v483_v48 = vsel %vm5189_vm2, %v478_v37, %v482_v20  ;;  %v488_v49 = vrot.slane %v487_v38, 4  ;;  %v495_v50 = vshrl.u32 %v211_v35, 16  ;;  %v498_v51 = vshll.u32 %v211_v35, 16 }
  0x31   : > { %v309_v52 = vor.u32 %v308_v44, %v305_v40  ;;  %v319_v53 = vor.u32 %v318_v46, %v314_v45  ;;  %v324_v54 = vrot.slane %v322_v47, 5  ;;  %v504_v56 = vshll.u32 %v5250_v41, 16  ;;  %v5308_v44 = vld [vmem:[%s5155_s7 + $0x8c] sm:$0x1] }
  0x32   : > { %v493_v58 = vsel %vm5189_vm2, %v488_v49, %v492_v26  ;;  %v497_v60 = vrot.slane %v495_v50, 4  ;;  %v500_v61 = vrot.slane %v498_v51, 5  ;;  %v508_v62 = vshrl.u32 %v5250_v41, 16  ;;  %v4890_v26 = vld [vmem:[%s6642_s1 + $0x28] sm:$0xff]   ;;  %v5318_v51 = vld [vmem:[%s5155_s7 + $0x30] sm:$0xf] }
  0x33   : > { %4398 = vmatpush3.bf16.msra.mxu0 %v4885_v17  ;;  %4830 = vmatpush3.bf16.msra.mxu1 %v4885_v17  ;;  %v5275_v1 = vcombine.low %v483_v48, %v493_v58  ;;  %v310_v3 = vrot.slane %v309_v52, 4  ;;  %v320_v8 = vrot.slane %v319_v53, 4  ;;  %v506_v9 = vrot.slane %v504_v56, 5 }
  0x34   : > { %4431 = vmatprep.subr.bf16.mxu1 %v4886_v42  ;;  %4479 = vmatprep.subr.bf16.mxu0 %v4887_v43  ;;  %v501_v12 = vor.u32 %v500_v61, %v497_v60  ;;  %v510_v14 = vrot.slane %v508_v62, 4  ;;  %v514_v15 = vshll.u32 %v213_v55, 16  ;;  %v327_v17 = vshrl.u32 %v5264_v57, 16  ;;  %v4893_v62 = vld [vmem:[%s6642_s1 + $0xa0] sm:$0xff]  }
  0x35   : > { %6688 = vst [vmem:[#allocation11_spill] sm:$0xff] %v5275_v1  ;;  %v315_v19 = vsel %vm5189_vm2, %v310_v3, %v314_v45  ;;  %v325_v20 = vsel %vm5189_vm2, %v320_v8, %v324_v54  ;;  %v330_v24 = vshll.u32 %v5264_v57, 16  ;;  %v336_v25 = vshll.u32 %v5273_v0, 16 }
  0x36   : > { %4400 = vmatmul.mubr.bf16.vlgmr.msra.gmra.mxu0 %v5247_v36  ;;  %4416 = vmatmul.mubr.bf16.vlgmr.msra.gmra.mxu1 %v5275_v1  ;;  %v5304_v30 = vcombine.low %v315_v19, %v325_v20  ;;  %v502_v31 = vrot.slane %v501_v12, 4  ;;  %v511_v32 = vor.u32 %v510_v14, %v506_v9  ;;  %v516_v34 = vrot.slane %v514_v15, 5  ;;  %v5340_v19 = vld [vmem:[%s5155_s7 + $0x38] sm:$0x1] }
  0x37   : > { %4432 = vmatpush3.bf16.msra.mxu1 %v4886_v42  ;;  %4480 = vmatpush3.bf16.msra.mxu0 %v4887_v43  ;;  %v329_v35 = vrot.slane %v327_v17, 4  ;;  %v332_v37 = vrot.slane %v330_v24, 5  ;;  %v338_v38 = vrot.slane %v336_v25, 5  ;;  %v340_v40 = vshrl.u32 %v5273_v0, 16  ;;  %v5486_v1 = vld [vmem:[%s5155_s7 + $0x58] sm:$0xf] }
  0x38   : > { %6689 = vst [vmem:[#allocation12_spill] sm:$0xff] %v5304_v30  ;;  %4433 = vmatprep.subr.bf16.mxu1 %v4888_v59  ;;  %4481 = vmatprep.subr.bf16.mxu0 %v4889_v2  ;;  %v507_v42 = vsel %vm5189_vm2, %v502_v31, %v506_v9  ;;  %v512_v43 = vrot.slane %v511_v32, 4  ;;  %v346_v45 = vshll.u32 %v5281_v10, 16  ;;  %v519_v46 = vshrl.u32 %v5284_v11, 16 }
  0x39   : > { %4403 = vmatprep.mubr.bf16.mxu0 %v5304_v30  ;;  %v333_v47 = vor.u32 %v332_v37, %v329_v35  ;;  %v342_v48 = vrot.slane %v340_v40, 4  ;;  %v522_v49 = vshll.u32 %v5284_v11, 16  ;;  %v528_v50 = vshll.u32 %v5288_v18, 16 }
  0x3a   : > { %v517_v52 = vsel %vm5189_vm2, %v512_v43, %v516_v34  ;;  %v348_v53 = vrot.slane %v346_v45, 5  ;;  %v521_v54 = vrot.slane %v519_v46, 4  ;;  %v532_v55 = vshrl.u32 %v5288_v18, 16  ;;  %v5345_v34 = vld [vmem:[%s5155_s7 + $0x90] sm:$0xf] }
  0x3b   : > { %4434 = vmatpush3.bf16.msra.mxu1 %v4888_v59  ;;  %4482 = vmatpush3.bf16.msra.mxu0 %v4889_v2  ;;  %v5323_v56 = vcombine.low %v507_v42, %v517_v52  ;;  %v334_v58 = vrot.slane %v333_v47, 4  ;;  %v343_v60 = vor.u32 %v342_v48, %v338_v38  ;;  %v524_v61 = vrot.slane %v522_v49, 5  ;;  %v4892_v59 = vld [vmem:[%s6642_s1 + $0x20] sm:$0xff]   ;;  %v5332_v2 = vld [vmem:[%s5155_s7 + $0x34] sm:$0xf]  ;;  %v4895_v48 = vld [vmem:[%s6642_s1 + $0x98] sm:$0xff]  }
  0x3c   : > { %4435 = vmatprep.subr.bf16.mxu1 %v4890_v26  ;;  %4483 = vmatprep.subr.bf16.mxu0 %v4891_v28  ;;  %v530_v3 = vrot.slane %v528_v50, 5  ;;  %v534_v8 = vrot.slane %v532_v55, 4  ;;  %v538_v9 = vshll.u32 %v5308_v44, 16  ;;  %v351_v12 = vshrl.u32 %v5318_v51, 16  ;;  %v5351_v42 = vld [vmem:[%s5155_s7 + $0x94] sm:$0xf] }
  0x3d   : > { %6690 = vst [vmem:[#allocation13_spill] sm:$0xff] %v5323_v56  ;;  %4419 = vmatprep.mubr.bf16.mxu1 %v5323_v56  ;;  %v339_v14 = vsel %vm5189_vm2, %v334_v58, %v338_v38  ;;  %v344_v15 = vrot.slane %v343_v60, 4  ;;  %v525_v17 = vor.u32 %v524_v61, %v521_v54  ;;  %v354_v20 = vshll.u32 %v5318_v51, 16  ;;  %v5360_v47 = vld [vmem:[%s5155_s7 + $0x98] sm:$0x1]  ;;  %v4896_v58 = vld [vmem:[%s6642_s1 + $0x10] sm:$0xff]  }
  0x3e   : > { %v535_v24 = vor.u32 %v534_v8, %v530_v3  ;;  %v540_v25 = vrot.slane %v538_v9, 5  ;;  %v353_v31 = vrot.slane %v351_v12, 4  ;;  %v360_v32 = vshll.u32 %v5332_v2, 16  ;;  %v5369_v54 = vld [vmem:[%s5155_s7 + $0x3c] sm:$0xf]  ;;  %v4897_v9 = vld [vmem:[%s6642_s1 + $0x90] sm:$0xff]  }
  0x3f   : > { %4436 = vmatpush3.bf16.msra.mxu1 %v4890_v26  ;;  %4484 = vmatpush3.bf16.msra.mxu0 %v4891_v28  ;;  %v349_v35 = vsel %vm5189_vm2, %v344_v15, %v348_v53  ;;  %v526_v37 = vrot.slane %v525_v17, 4  ;;  %v356_v38 = vrot.slane %v354_v20, 5  ;;  %v364_v40 = vshrl.u32 %v5332_v2, 16  ;;  %v4894_v26 = vld [vmem:[%s6642_s1 + $0x18] sm:$0xff]   ;;  %v5372_v55 = vld [vmem:[%s5155_s7 + $0x40] sm:$0xf] }
  0x40   : > { %4437 = vmatprep.subr.bf16.mxu1 %v4892_v59  ;;  %4485 = vmatprep.subr.bf16.mxu0 %v4893_v62  ;;  %v5356_v28 = vcombine.low %v339_v14, %v349_v35  ;;  %v536_v43 = vrot.slane %v535_v24, 4  ;;  %v362_v45 = vrot.slane %v360_v32, 5  ;;  %v370_v46 = vshll.u32 %v5340_v19, 16  ;;  %v5393_v32 = vld [vmem:[%s5155_s7 + $0x9c] sm:$0xf] }
  0x41   : > { %v531_v49 = vsel %vm5189_vm2, %v526_v37, %v530_v3  ;;  %v357_v50 = vor.u32 %v356_v38, %v353_v31  ;;  %v366_v52 = vrot.slane %v364_v40, 4  ;;  %v543_v53 = vshrl.u32 %v5345_v34, 16  ;;  %v5390_v31 = vld [vmem:[%s5155_s7 + $0x44] sm:$0x1]  ;;  %v5401_v40 = vld [vmem:[%s5155_s7 + $0xa0] sm:$0xf] }
  0x42   : > { %6691 = vst [vmem:[#allocation14_spill] sm:$0xff] %v5356_v28  ;;  %4404 = vmatmul.mubr.bf16.gmra.mxu0 %v5356_v28  ;;  %v541_v60 = vsel %vm5189_vm2, %v536_v43, %v540_v25  ;;  %v372_v61 = vrot.slane %v370_v46, 5  ;;  %v546_v3 = vshll.u32 %v5345_v34, 16  ;;  %v552_v8 = vshll.u32 %v5351_v42, 16 }
  0x43   : > { %4438 = vmatpush3.bf16.msra.mxu1 %v4892_v59  ;;  %v5385_v12 = vcombine.low %v531_v49, %v541_v60  ;;  %4486 = vmatpush3.bf16.msra.mxu0 %v4893_v62  ;;  %v358_v14 = vrot.slane %v357_v50, 4  ;;  %v367_v15 = vor.u32 %v366_v52, %v362_v45  ;;  %v545_v17 = vrot.slane %v543_v53, 4 }
  0x44   : > { %4439 = vmatprep.subr.bf16.mxu1 %v4894_v26  ;;  %v548_v20 = vrot.slane %v546_v3, 5  ;;  %v554_v59 = vrot.slane %v552_v8, 5  ;;  %v556_v24 = vshrl.u32 %v5351_v42, 16  ;;  %v562_v25 = vshll.u32 %v5360_v47, 16  ;;  %4487 = vmatprep.subr.bf16.mxu0 %v4895_v48  ;;  %v4898_v3 = vld [vmem:[%s6642_s1 + $0x8] sm:$0xff]  }
  0x45   : > { %6692 = vst [vmem:[#allocation15_spill] sm:$0xff] %v5385_v12  ;;  %4420 = vmatmul.mubr.bf16.gmra.mxu1 %v5385_v12  ;;  %v363_v62 = vsel %vm5189_vm2, %v358_v14, %v362_v45  ;;  %v368_v35 = vrot.slane %v367_v15, 4  ;;  %v375_v37 = vshrl.u32 %v5369_v54, 16  ;;  %v378_v38 = vshll.u32 %v5369_v54, 16 }
  0x46   : > { %v549_v43 = vor.u32 %v548_v20, %v545_v17  ;;  %v558_v46 = vrot.slane %v556_v24, 4  ;;  %v564_v49 = vrot.slane %v562_v25, 5  ;;  %v384_v50 = vshll.u32 %v5372_v55, 16 }
  0x47   : > { %4440 = vmatpush3.bf16.msra.mxu1 %v4894_v26  ;;  %v373_v52 = vsel %vm5189_vm2, %v368_v35, %v372_v61  ;;  %v377_v53 = vrot.slane %v375_v37, 4  ;;  %v380_v60 = vrot.slane %v378_v38, 5  ;;  %v388_v45 = vshrl.u32 %v5372_v55, 16  ;;  %4488 = vmatpush3.bf16.msra.mxu0 %v4895_v48  ;;  %v4899_v26 = vld [vmem:[%s6642_s1 + $0x88] sm:$0xff]   ;;  %v5421_v35 = vld [vmem:[%s5155_s7 + $0xa4] sm:$0x1] }
  0x48   : > { %4441 = vmatprep.subr.bf16.mxu1 %v4896_v58  ;;  %v5410_v8 = vcombine.low %v363_v62, %v373_v52  ;;  %v550_v14 = vrot.slane %v549_v43, 4  ;;  %v559_v15 = vor.u32 %v558_v46, %v554_v59  ;;  %v386_v17 = vrot.slane %v384_v50, 5  ;;  %4489 = vmatprep.subr.bf16.mxu0 %v4897_v9 }
  0x49   : > { %v381_v61 = vor.u32 %v380_v60, %v377_v53  ;;  %v390_v20 = vrot.slane %v388_v45, 4  ;;  %v394_v48 = vshll.u32 %v5390_v31, 16  ;;  %v567_v24 = vshrl.u32 %v5393_v32, 16  ;;  %v5426_v53 = vld [vmem:[%s5155_s7 + $0x48] sm:$0xf] }
  0x4a   : > { %6693 = vst [vmem:[#allocation16_spill] sm:$0xff] %v5410_v8  ;;  %4407 = vmatprep.mubr.bf16.mxu0 %v5410_v8  ;;  %v555_v25 = vsel %vm5189_vm2, %v550_v14, %v554_v59  ;;  %v560_v62 = vrot.slane %v559_v15, 4  ;;  %v570_v37 = vshll.u32 %v5393_v32, 16  ;;  %v576_v38 = vshll.u32 %v5401_v40, 16  ;;  %v4900_v59 = vld [vmem:[%s6642_s1] sm:$0xff]  }
  0x4b   : > { %4442 = vmatpush3.bf16.msra.mxu1 %v4896_v58  ;;  %v382_v43 = vrot.slane %v381_v61, 4  ;;  %v391_v46 = vor.u32 %v390_v20, %v386_v17  ;;  %v396_v50 = vrot.slane %v394_v48, 5  ;;  %v569_v52 = vrot.slane %v567_v24, 4  ;;  %4490 = vmatpush3.bf16.msra.mxu0 %v4897_v9  ;;  %v5435_v15 = vld [vmem:[%s5155_s7 + $0x4c] sm:$0xf]  ;;  %v4901_v9 = vld [vmem:[%s6642_s1 + $0x80] sm:$0xff]  }
  0x4c   : > { %4443 = vmatprep.subr.bf16.mxu1 %v4898_v3  ;;  %v565_v60 = vsel %vm5189_vm2, %v560_v62, %v564_v49  ;;  %v572_v45 = vrot.slane %v570_v37, 5  ;;  %v578_v14 = vrot.slane %v576_v38, 5  ;;  %v580_v58 = vshrl.u32 %v5401_v40, 16  ;;  %4491 = vmatprep.subr.bf16.mxu0 %v4899_v26  ;;  %v5446_v37 = vld [vmem:[%s5155_s7 + $0x50] sm:$0x1] }
  0x4d   : > { %v5440_v61 = vcombine.low %v555_v25, %v565_v60  ;;  %v387_v20 = vsel %vm5189_vm2, %v382_v43, %v386_v17  ;;  %v392_v48 = vrot.slane %v391_v46, 4  ;;  %v586_v49 = vshll.u32 %v5421_v35, 16  ;;  %v5456_v46 = vld [vmem:[%s5155_s7 + $0xa8] sm:$0xf] }
  0x4e   : > { %v573_v24 = vor.u32 %v572_v45, %v569_v52  ;;  %v582_v62 = vrot.slane %v580_v58, 4  ;;  %v399_v38 = vshrl.u32 %v5426_v53, 16  ;;  %v402_v63 = vshll.u32 %v5426_v53, 16  ;;  %6695 = vst [vmem:[#allocation18_spill] sm:$0xff] %v5456_v46  ;;  %v5461_v52 = vld [vmem:[%s6642_s1 + $0xf8] sm:$0xff]  }
  0x4f   : > { %6694 = vst [vmem:[#allocation17_spill] sm:$0xff] %v5440_v61  ;;  %4444 = vmatpush3.bf16.msra.mxu1 %v4898_v3  ;;  %4423 = vmatprep.mubr.bf16.mxu1 %v5440_v61  ;;  %v397_v25 = vsel %vm5189_vm2, %v392_v48, %v396_v50  ;;  %v588_v60 = vrot.slane %v586_v49, 5  ;;  %v408_v17 = vshll.u32 %v5435_v15, 16  ;;  %v412_v43 = vshrl.u32 %v5435_v15, 16  ;;  %v5466_v48 = vld [vmem:[%s5155_s7 + $0xac] sm:$0xf] }
  0x50   : > { %4492 = vmatpush3.bf16.msra.mxu0 %v4899_v26  ;;  %v5463_v3 = vcombine.low %v387_v20, %v397_v25  ;;  %v574_v45 = vrot.slane %v573_v24, 4  ;;  %v583_v58 = vor.u32 %v582_v62, %v578_v14  ;;  %v401_v50 = vrot.slane %v399_v38, 4  ;;  %6697 = vst [vmem:[#allocation20_spill] sm:$0xff] %v5466_v48  ;;  %4445 = vmatprep.subr.bf16.mxu1 %v4900_v59  ;;  %v5471_v49 = vld [vmem:[%s6642_s1 + $0x138] sm:$0xff]   ;;  %v5475_v20 = vld [vmem:[%s5155_s7 + $0xb0] sm:$0x1] }
  0x51   : > { %4493 = vmatprep.subr.bf16.mxu0 %v4901_v9  ;;  %v404_v26 = vrot.slane %v402_v63, 5  ;;  %v410_v13 = vrot.slane %v408_v17, 5  ;;  %v414_v61 = vrot.slane %v412_v43, 4  ;;  %v418_v12 = vshll.u32 %v5446_v37, 16  ;;  %6698 = vst [vmem:[#allocation21_spill] sm:$0xff] %v5475_v20 }
  0x52   : > { %6696 = vst [vmem:[#allocation19_spill] sm:$0xff] %v5463_v3  ;;  %v5478_v24 = vld [vmem:[%s5155_s7 + $0x54] sm:$0xf]  ;;  %4408 = vmatmul.mubr.bf16.gmra.mxu0 %v5463_v3  ;;  %v579_v62 = vsel %vm5189_vm2, %v574_v45, %v578_v14  ;;  %v584_v38 = vrot.slane %v583_v58, 4  ;;  %v591_v25 = vshrl.u32 %v5456_v46, 16  ;;  %v594_v56 = vshll.u32 %v5456_v46, 16 }
  0x53   : > { %4446 = vmatpush3.bf16.msra.mxu1 %v4900_v59  ;;  %v405_v63 = vor.u32 %v404_v26, %v401_v50  ;;  %v415_v17 = vor.u32 %v414_v61, %v410_v13  ;;  %v420_v43 = vrot.slane %v418_v12, 5  ;;  %v600_v7 = vshll.u32 %v5466_v48, 16  ;;  %v5500_v3 = vld [vmem:[%s5155_s7 + $0xb4] sm:$0xf] }
  0x54   : > { %4494 = vmatpush3.bf16.msra.mxu0 %v4901_v9  ;;  %4527 = vmatprep.subr.bf16.mxu1 %v5461_v52  ;;  %v589_v14 = vsel %vm5189_vm2, %v584_v38, %v588_v60  ;;  %v593_v45 = vrot.slane %v591_v25, 4  ;;  %v596_v58 = vrot.slane %v594_v56, 5  ;;  %v604_v59 = vshrl.u32 %v5466_v48, 16  ;;  %v5497_v9 = vld [vmem:[%s5155_s7 + $0x5c] sm:$0x1] }
  0x55   : > { %4575 = vmatprep.subr.bf16.mxu0 %v5471_v49  ;;  %v5494_v61 = vcombine.low %v579_v62, %v589_v14  ;;  %v406_v12 = vrot.slane %v405_v63, 4  ;;  %v416_v50 = vrot.slane %v415_v17, 4  ;;  %v602_v26 = vrot.slane %v600_v7, 5  ;;  %v5505_v60 = vld [vmem:[%s5155_s7 + $0xb8] sm:$0xf] }
  0x56   : > { %v597_v8 = vor.u32 %v596_v58, %v593_v45  ;;  %v606_v28 = vrot.slane %v604_v59, 4  ;;  %v610_v30 = vshll.u32 %v5475_v20, 16  ;;  %v423_v56 = vshrl.u32 %v5478_v24, 16  ;;  %v5518_v20 = vld [vmem:[%s5155_s7 + $0xbc] sm:$0x1] }
  0x57   : > { %6699 = vst [vmem:[#allocation22_spill] sm:$0xff] %v5494_v61  ;;  %4424 = vmatmul.mubr.bf16.gmra.mxu1 %v5494_v61  ;;  %v411_v62 = vsel %vm5189_vm2, %v406_v12, %v410_v13  ;;  %v421_v7 = vsel %vm5189_vm2, %v416_v50, %v420_v43  ;;  %v426_v38 = vshll.u32 %v5478_v24, 16  ;;  %v432_v25 = vshll.u32 %v5486_v1, 16  ;;  %6701 = vst [vmem:[#allocation24_spill] sm:$0xff] %v5518_v20 }
  0x58   : > { %v5514_v63 = vcombine.low %v411_v62, %v421_v7  ;;  %v598_v17 = vrot.slane %v597_v8, 4  ;;  %v607_v14 = vor.u32 %v606_v28, %v602_v26  ;;  %v612_v45 = vrot.slane %v610_v30, 5 }
  0x59   : > { %v425_v58 = vrot.slane %v423_v56, 4  ;;  %v428_v59 = vrot.slane %v426_v38, 5  ;;  %v434_v36 = vrot.slane %v432_v25, 5  ;;  %v436_v61 = vshrl.u32 %v5486_v1, 16 }
  0x5a   : > { %6700 = vst [vmem:[#allocation23_spill] sm:$0xff] %v5514_v63  ;;  %4411 = vmatprep.mubr.bf16.mxu0 %v5514_v63  ;;  %v603_v13 = vsel %vm5189_vm2, %v598_v17, %v602_v26  ;;  %v608_v43 = vrot.slane %v607_v14, 4  ;;  %v442_v12 = vshll.u32 %v5497_v9, 16  ;;  %v615_v50 = vshrl.u32 %v5500_v3, 16 }
  0x5b   : > { %v429_v8 = vor.u32 %v428_v59, %v425_v58  ;;  %v438_v28 = vrot.slane %v436_v61, 4  ;;  %v618_v30 = vshll.u32 %v5500_v3, 16  ;;  %v624_v56 = vshll.u32 %v5505_v60, 16 }
  0x5c   : > { %v613_v62 = vsel %vm5189_vm2, %v608_v43, %v612_v45  ;;  %v444_v7 = vrot.slane %v442_v12, 5  ;;  %v617_v38 = vrot.slane %v615_v50, 4  ;;  %v628_v25 = vshrl.u32 %v5505_v60, 16 }
  0x5d   : > { %v5530_v63 = vcombine.low %v603_v13, %v613_v62  ;;  %v430_v26 = vrot.slane %v429_v8, 4  ;;  %v439_v17 = vor.u32 %v438_v28, %v434_v36  ;;  %v620_v14 = vrot.slane %v618_v30, 5 }
  0x5e   : > { %v626_v46 = vrot.slane %v624_v56, 5  ;;  %v630_v48 = vrot.slane %v628_v25, 4  ;;  %v634_v61 = vshll.u32 %v5518_v20, 16  ;;  %v6703_v58 = vmov 0 }
  0x5f   : > { %6702 = vst [vmem:[#allocation25_spill] sm:$0xff] %v5530_v63  ;;  %v6704_v58 = vsel %vm5535_vm5, 4294967295, %v6703_v58  ;;  %v3792_v45 = vrot.slane %v5161_v4, 9  ;;  %4427 = vmatprep.mubr.bf16.mxu1 %v5530_v63  ;;  %v435_v59 = vsel %vm5189_vm2, %v430_v26, %v434_v36  ;;  %v440_v13 = vrot.slane %v439_v17, 4 }
  0x60   : > { %6705 = vst [vmem:[#allocation26_spill] sm:$0xff] %v6704_v58  ;;  %v621_v43 = vor.u32 %v620_v14, %v617_v38  ;;  %v1254_v12 = vrot.slane %v5164_v5, 5  ;;  %v631_v50 = vor.u32 %v630_v48, %v626_v46  ;;  %v636_v8 = vrot.slane %v634_v61, 5 }
  0x61   : > { %v3793_v28 = vrot.slane %v5182_v23, 9  ;;  %v1261_v30 = vrot.slane %v5194_v33, 5  ;;  %v445_v56 = vsel %vm5189_vm2, %v440_v13, %v444_v7  ;;  %v6706_v26 = vrot.slane %v5167_v6, 5 }
  0x62   : > { %v622_v62 = vrot.slane %v621_v43, 4  ;;  %v1255_v25 = vsel %vm5535_vm5, %v3792_v45, %v1254_v12  ;;  %v1256_v63 = vrot.slane %v1254_v12, 4  ;;  %v5550_v20 = vcombine.low %v435_v59, %v445_v56 }
  0x63   : > { %v632_v36 = vrot.slane %v631_v50, 4  ;;  %v1263_v38 = vrot.slane %v1261_v30, 4  ;;  %v5560_v33 = vcombine.low %v5222_v16, %v5230_v21  ;;  %v3794_v7 = vrot.slane %v5222_v16, 9 }
  0x64   : > { %v627_v48 = vsel %vm5189_vm2, %v622_v62, %v626_v46  ;;  %v1258_v23 = vsel %vm5535_vm5, %v1256_v63, %v6706_v26  ;;  %4412 = vmatmul.mubr.bf16.gmra.mxu0 %v5550_v20  ;;  %v3768_v14 = vcombine.low %v5161_v4, %v5164_v5  ;;  %v1268_v6 = vrot.slane %v5230_v21, 5 }
  0x65   : > { %v637_v17 = vsel %vm5189_vm2, %v632_v36, %v636_v8  ;;  %v3824_v46 = vcombine.low %v1255_v25, %v1258_v23  ;;  %v1262_v63 = vsel %vm5535_vm5, %v3793_v28, %v1261_v30  ;;  %v6707_v45 = vrot.slane %v5198_v39, 5  ;;  %v4908_v36 = vld [vmem:[%s6642_s1 + $0xf0] sm:$0xff]  }
  0x66   : > { %v5569_v61 = vcombine.low %v627_v48, %v637_v17  ;;  %v1271_v59 = vrot.slane %v5238_v27, 5  ;;  %v1269_v13 = vsel %vm5535_vm5, %v3794_v7, %v1268_v6  ;;  %v1270_v4 = vrot.slane %v1268_v6, 4  ;;  %v6724_v58 = vld [vmem:[#allocation25_spill] sm:$0xff] }
  0x67   : > { %v1265_v16 = vsel %vm5535_vm5, %v1263_v38, %v6707_v45  ;;  %4495 = vmatprep.mubr.bf16.mxu0 %v3824_v46  ;;  %v1275_v5 = vrot.slane %v5273_v0, 5  ;;  %v3795_v21 = vrot.slane %v5264_v57, 9  ;;  %v1278_v43 = vrot.slane %v5281_v10, 5  ;;  %v4909_v10 = vld [vmem:[%s6642_s1 + $0x130] sm:$0xff]  }
  0x68   : > { %4428 = vmatmul.mubr.bf16.gmra.mxu1 %v5569_v61  ;;  %v1282_v39 = vrot.slane %v5332_v2, 5  ;;  %v5585_v12 = vcombine.low %v1262_v63, %v1265_v16  ;;  %v1272_v27 = vsel %vm5535_vm5, %v1270_v4, %v1271_v59  ;;  %v3796_v8 = vrot.slane %v5318_v51, 9  ;;  %v4912_v16 = vld [vmem:[%s6642_s1 + $0xe8] sm:$0xff]  }
  0x69   : > { %4447 = vmatprep.mubr.bf16.mxu1 %v3768_v14  ;;  %v1277_v50 = vrot.slane %v1275_v5, 4  ;;  %v5590_v28 = vcombine.low %v1269_v13, %v1272_v27  ;;  %v1285_v56 = vrot.slane %v5340_v19, 5  ;;  %v1289_v62 = vrot.slane %v5372_v55, 5  ;;  %v4913_v14 = vld [vmem:[%s6642_s1 + $0x128] sm:$0xff]   ;;  %v5632_v13 = vld [vmem:[%s5155_s7 + $0x64] sm:$0xf] }
  0x6a   : > { %v1284_v30 = vrot.slane %v1282_v39, 4  ;;  %v1276_v25 = vsel %vm5535_vm5, %v3795_v21, %v1275_v5  ;;  %v3797_v38 = vrot.slane %v5369_v54, 9  ;;  %v1283_v48 = vsel %vm5535_vm5, %v3796_v8, %v1282_v39 }
  0x6b   : > { %v1279_v19 = vsel %vm5535_vm5, %v1277_v50, %v1278_v43  ;;  %v1292_v26 = vrot.slane %v5390_v31, 5  ;;  %v1296_v23 = vrot.slane %v5435_v15, 5  ;;  %v1291_v17 = vrot.slane %v1289_v62, 4 }
  0x6c   : > { %4496 = vmatmul.mubr.bf16.vlgmr.msra.gmra.mxu0 %v5585_v12  ;;  %v1286_v7 = vsel %vm5535_vm5, %v1284_v30, %v1285_v56  ;;  %v3798_v46 = vrot.slane %v5426_v53, 9  ;;  %v1303_v6 = vrot.slane %v5486_v1, 5  ;;  %v1299_v63 = vrot.slane %v5446_v37, 5  ;;  %v5667_v30 = vld [vmem:[%s5155_s7 + $0x60] sm:$0xf] }
  0x6d   : > { %4576 = vmatpush3.bf16.msra.mxu0 %v5471_v49  ;;  %4499 = vmatprep.mubr.bf16.mxu0 %v5590_v28  ;;  %v1298_v31 = vrot.slane %v1296_v23, 4  ;;  %v5623_v49 = vcombine.low %v1276_v25, %v1279_v19  ;;  %v5625_v45 = vcombine.low %v1283_v48, %v1286_v7  ;;  %v3799_v59 = vrot.slane %v5478_v24, 9 }
  0x6e   : > { %4577 = vmatprep.subr.bf16.mxu0 %v4909_v10  ;;  %v1310_v37 = vrot.slane %v5632_v13, 5  ;;  %v1293_v4 = vsel %vm5535_vm5, %v1291_v17, %v1292_v26  ;;  %v1305_v5 = vrot.slane %v1303_v6, 4  ;;  %v1306_v21 = vrot.slane %v5497_v9, 5  ;;  %v4917_v9 = vld [vmem:[%s6642_s1 + $0x120] sm:$0xff]  }
  0x6f   : > { %v5642_v43 = vcombine.low %v5264_v57, %v5273_v0  ;;  %v1297_v39 = vsel %vm5535_vm5, %v3798_v46, %v1296_v23  ;;  %v1300_v27 = vsel %vm5535_vm5, %v1298_v31, %v1299_v63  ;;  %v5650_v50 = vcombine.low %v5318_v51, %v5332_v2  ;;  %v4916_v0 = vld [vmem:[%s6642_s1 + $0xe0] sm:$0xff]  }
  0x70   : > { %4448 = vmatmul.mubr.bf16.vlgmr.msra.gmra.mxu1 %v5234_v22  ;;  %v5654_v8 = vcombine.low %v5369_v54, %v5372_v55  ;;  %v5658_v57 = vcombine.low %v5426_v53, %v5435_v15  ;;  %v3800_v51 = vrot.slane %v5667_v30, 9  ;;  %v5675_v54 = vsel %vm5535_vm5, %v3799_v59, %v1303_v6  ;;  %v4970_v53 = vld [vmem:[%s5155_s7 + $0x68] sm:$0x1]  ;;  %v4920_v6 = vld [vmem:[%s6642_s1 + $0xd8] sm:$0xff]  }
  0x71   : > { %4528 = vmatpush3.bf16.msra.mxu1 %v5461_v52  ;;  %4451 = vmatprep.mubr.bf16.mxu1 %v5560_v33  ;;  %v1290_v52 = vsel %vm5535_vm5, %v3797_v38, %v1289_v62  ;;  %v1312_v55 = vrot.slane %v1310_v37, 4  ;;  %v1313_v15 = vrot.slane %v4970_v53, 5  ;;  %v5679_v56 = vcombine.low %v1297_v39, %v1300_v27  ;;  %v4921_v62 = vld [vmem:[%s6642_s1 + $0x118] sm:$0xff]   ;;  %v4924_v53 = vld [vmem:[%s6642_s1 + $0xd0] sm:$0xff]  }
  0x72   : > { %4529 = vmatprep.subr.bf16.mxu1 %v4908_v36  ;;  %4578 = vmatpush3.bf16.msra.mxu0 %v4909_v10  ;;  %v5671_v2 = vcombine.low %v1290_v52, %v1293_v4  ;;  %v1307_v10 = vsel %vm5535_vm5, %v1305_v5, %v1306_v21  ;;  %v5688_v25 = vcombine.low %v5284_v11, %v5288_v18  ;;  %v3803_v19 = vrot.slane %v5284_v11, 9  ;;  %v4925_v4 = vld [vmem:[%s6642_s1 + $0x110] sm:$0xff]   ;;  %v6708_v5 = vld [vmem:[#allocation20_spill] sm:$0xff] }
  0x73   : > { %4579 = vmatprep.subr.bf16.mxu0 %v4913_v14  ;;  %v1331_v48 = vrot.slane %v5288_v18, 5  ;;  %v1334_v26 = vrot.slane %v5308_v44, 5  ;;  %v1311_v23 = vsel %vm5535_vm5, %v3800_v51, %v1310_v37  ;;  %v1324_v7 = vrot.slane %v5250_v41, 5  ;;  %v6709_v21 = vld [vmem:[#allocation18_spill] sm:$0xff]  ;;  %v6710_v51 = vld [vmem:[#allocation21_spill] sm:$0xff] }
  0x74   : > { %4500 = vmatmul.mubr.bf16.gmra.mxu0 %v5623_v49  ;;  %v5703_v17 = vcombine.low %v5345_v34, %v5351_v42  ;;  %v1314_v11 = vsel %vm5535_vm5, %v1312_v55, %v1313_v15  ;;  %v1338_v46 = vrot.slane %v5351_v42, 5  ;;  %v1341_v31 = vrot.slane %v5360_v47, 5 }
  0x75   : > { %4530 = vmatpush3.bf16.msra.mxu1 %v4908_v36  ;;  %4503 = vmatprep.mubr.bf16.mxu0 %v5625_v45  ;;  %v5691_v36 = vld [vmem:[%s5155_s7 + $0x70] sm:$0xf]  ;;  %v1332_v18 = vsel %vm5535_vm5, %v3803_v19, %v1331_v48  ;;  %v1333_v44 = vrot.slane %v1331_v48, 4  ;;  %v3805_v63 = vrot.slane %v5393_v32, 9  ;;  %v1348_v52 = vrot.slane %v5421_v35, 5 }
  0x76   : > { %4531 = vmatprep.subr.bf16.mxu1 %v4912_v16  ;;  %4580 = vmatpush3.bf16.msra.mxu0 %v4913_v14  ;;  %v1317_v38 = vrot.slane %v5691_v36, 5  ;;  %v3804_v14 = vrot.slane %v5345_v34, 9  ;;  %v5718_v34 = vcombine.low %v5393_v32, %v5401_v40  ;;  %v1340_v37 = vrot.slane %v1338_v46, 4 }
  0x77   : > { %4581 = vmatprep.subr.bf16.mxu0 %v4917_v9  ;;  %v1335_v59 = vsel %vm5535_vm5, %v1333_v44, %v1334_v26  ;;  %v5736_v39 = vcombine.low %v6709_v21, %v6708_v5  ;;  %v3806_v27 = vrot.slane %v6709_v21, 9  ;;  %v1355_v55 = vrot.slane %v6710_v51, 5  ;;  %v4933_v51 = vld [vmem:[%s6642_s1 + $0x100] sm:$0xff]  }
  0x78   : > { %4452 = vmatmul.mubr.bf16.gmra.mxu1 %v5642_v43  ;;  %v1339_v42 = vsel %vm5535_vm5, %v3804_v14, %v1338_v46  ;;  %v5727_v47 = vcombine.low %v1332_v18, %v1335_v59  ;;  %v1342_v35 = vsel %vm5535_vm5, %v1340_v37, %v1341_v31  ;;  %v5754_v19 = vcombine.low %v5500_v3, %v5505_v60  ;;  %v4972_v31 = vld [vmem:[%s5155_s7 + $0x6c] sm:$0xf]  ;;  %v4973_v59 = vld [vmem:[%s5155_s7 + $0x74] sm:$0x1] }
  0x79   : > { %4455 = vmatprep.mubr.bf16.mxu1 %v5650_v50  ;;  %4532 = vmatpush3.bf16.msra.mxu1 %v4912_v16  ;;  %v1345_v16 = vrot.slane %v5401_v40, 5  ;;  %v5748_v15 = vcombine.low %v1339_v42, %v1342_v35  ;;  %v3807_v48 = vrot.slane %v5500_v3, 9  ;;  %v1359_v44 = vrot.slane %v5505_v60, 5  ;;  %v4929_v3 = vld [vmem:[%s6642_s1 + $0x108] sm:$0xff]   ;;  %v4975_v35 = vld [vmem:[%s5155_s7 + $0x80] sm:$0x1] }
  0x7a   : > { %4533 = vmatprep.subr.bf16.mxu1 %v4916_v0  ;;  %4582 = vmatpush3.bf16.msra.mxu0 %v4917_v9  ;;  %v1352_v9 = vrot.slane %v6708_v5, 5  ;;  %v5764_v46 = vcombine.low %v5675_v54, %v1307_v10  ;;  %v1320_v60 = vrot.slane %v4973_v59, 5  ;;  %v5777_v37 = vcombine.low %v1311_v23, %v1314_v11  ;;  %v4928_v5 = vld [vmem:[%s6642_s1 + $0xc8] sm:$0xff]  }
  0x7b   : > { %4583 = vmatprep.subr.bf16.mxu0 %v4921_v62  ;;  %v1346_v32 = vsel %vm5535_vm5, %v3805_v63, %v1345_v16  ;;  %v1347_v40 = vrot.slane %v1345_v16, 4  ;;  %v3801_v63 = vrot.slane %v4972_v31, 9  ;;  %v1360_v54 = vsel %vm5535_vm5, %v3807_v48, %v1359_v44  ;;  %v4976_v48 = vld [vmem:[%s5155_s7 + $0x7c] sm:$0xf] }
  0x7c   : > { %4504 = vmatmul.mubr.bf16.gmra.mxu0 %v5671_v2  ;;  %v1353_v14 = vsel %vm5535_vm5, %v3806_v27, %v1352_v9  ;;  %v1354_v18 = vrot.slane %v1352_v9, 4  ;;  %v1361_v10 = vrot.slane %v1359_v44, 4  ;;  %v1326_v21 = vrot.slane %v1324_v7, 4  ;;  %v5857_v44 = vld [vmem:[%s5155_s7 + $0xc0] sm:$0xf] }
  0x7d   : > { %4534 = vmatpush3.bf16.msra.mxu1 %v4916_v0  ;;  %4507 = vmatprep.mubr.bf16.mxu0 %v5679_v56  ;;  %v1349_v0 = vsel %vm5535_vm5, %v1347_v40, %v1348_v52  ;;  %v1319_v52 = vrot.slane %v1317_v38, 4  ;;  %v1327_v27 = vrot.slane %v4975_v35, 5  ;;  %v5794_v11 = vcombine.low %v5478_v24, %v5486_v1  ;;  %v6716_v35 = vld [vmem:[#allocation19_spill] sm:$0xff] }
  0x7e   : > { %4535 = vmatprep.subr.bf16.mxu1 %v4920_v6  ;;  %4584 = vmatpush3.bf16.msra.mxu0 %v4921_v62  ;;  %v5757_v26 = vcombine.low %v1346_v32, %v1349_v0  ;;  %v6711_v62 = vld [vmem:[#allocation24_spill] sm:$0xff]  ;;  %v1356_v42 = vsel %vm5535_vm5, %v1354_v18, %v1355_v55  ;;  %v4974_v32 = vld [vmem:[%s5155_s7 + $0x78] sm:$0xf]  ;;  %v5804_v55 = vcombine.low %v5667_v30, %v5632_v13 }
  0x7f   : > { %4585 = vmatprep.subr.bf16.mxu0 %v4925_v4  ;;  %v1362_v16 = vrot.slane %v6711_v62, 5  ;;  %v3802_v40 = vrot.slane %v4974_v32, 9  ;;  %v1318_v1 = vsel %vm5535_vm5, %v3801_v63, %v1317_v38  ;;  %v1321_v24 = vsel %vm5535_vm5, %v1319_v52, %v1320_v60  ;;  %v4935_v38 = vld [vmem:[%s6642_s1 + $0x1b8] sm:$0xff]  }
  0x80   : > { %4456 = vmatmul.mubr.bf16.gmra.mxu1 %v5654_v8  ;;  %v1328_v30 = vsel %vm5535_vm5, %v1326_v21, %v1327_v27  ;;  %v5835_v0 = vcombine.low %v4972_v31, %v5691_v36  ;;  %v5852_v36 = vld [vmem:[%s5155_s7 + $0xc4] sm:$0xf]  ;;  %v5860_v31 = vld [vmem:[%s5155_s7 + $0xc8] sm:$0x1]  ;;  %v3898_v63 = vrot.slane %v5857_v44, 9  ;;  %v6712_v60 = vld [vmem:[#allocation10_spill] sm:$0xff] }
  0x81   : > { %4459 = vmatprep.mubr.bf16.mxu1 %v5658_v57  ;;  %4536 = vmatpush3.bf16.msra.mxu1 %v4920_v6  ;;  %v5785_v6 = vcombine.low %v1353_v14, %v1356_v42  ;;  %v1363_v23 = vsel %vm5535_vm5, %v1361_v10, %v1362_v16  ;;  %v1325_v13 = vsel %vm5535_vm5, %v3802_v40, %v1324_v7  ;;  %v4934_v7 = vld [vmem:[%s6642_s1 + $0x178] sm:$0xff]   ;;  %v2239_v18 = vrot.slane %v5852_v36, 5  ;;  %v6713_v10 = vld [vmem:[#allocation12_spill] sm:$0xff] }
  0x82   : > { %4537 = vmatprep.subr.bf16.mxu1 %v4924_v53  ;;  %4586 = vmatpush3.bf16.msra.mxu0 %v4925_v4  ;;  %v5796_v9 = vcombine.low %v1360_v54, %v1363_v23  ;;  %v4932_v4 = vld [vmem:[%s6642_s1 + $0xc0] sm:$0xff]   ;;  %v5829_v41 = vcombine.low %v1325_v13, %v1328_v30  ;;  %v5839_v14 = vcombine.low %v4974_v32, %v4976_v48  ;;  %v2242_v62 = vrot.slane %v5860_v31, 5  ;;  %v4937_v54 = vld [vmem:[%s6642_s1 + $0x1b0] sm:$0xff]   ;;  %v4939_v40 = vld [vmem:[%s6642_s1 + $0x1a8] sm:$0xff]  }
  0x83   : > { %4587 = vmatprep.subr.bf16.mxu0 %v4929_v3  ;;  %v2240_v16 = vsel %vm5535_vm5, %v3898_v63, %v2239_v18  ;;  %v6714_v52 = vld [vmem:[#allocation14_spill] sm:$0xff]  ;;  %v6715_v21 = vld [vmem:[#allocation16_spill] sm:$0xff]  ;;  %v6719_v48 = vld [vmem:[#allocation11_spill] sm:$0xff] }
  0x84   : > { %4508 = vmatmul.mubr.bf16.gmra.mxu0 %v5764_v46  ;;  %v4936_v32 = vld [vmem:[%s6642_s1 + $0x170] sm:$0xff]   ;;  %v4940_v27 = vld [vmem:[%s6642_s1 + $0x160] sm:$0xff]   ;;  %v4943_v23 = vld [vmem:[%s6642_s1 + $0x198] sm:$0xff]  }
  0x85   : > { %4538 = vmatpush3.bf16.msra.mxu1 %v4924_v53  ;;  %4511 = vmatprep.mubr.bf16.mxu0 %v5777_v37  ;;  %v5827_v53 = vcombine.low %v1318_v1, %v1321_v24  ;;  %v4945_v1 = vld [vmem:[%s6642_s1 + $0x190] sm:$0xff]   ;;  %v6717_v24 = vld [vmem:[#allocation23_spill] sm:$0xff]  ;;  %v4947_v13 = vld [vmem:[%s6642_s1 + $0x188] sm:$0xff]  }
  0x86   : > { %4539 = vmatprep.subr.bf16.mxu1 %v4928_v5  ;;  %4588 = vmatpush3.bf16.msra.mxu0 %v4929_v3  ;;  %v2241_v3 = vrot.slane %v2239_v18, 4  ;;  %v4946_v30 = vld [vmem:[%s6642_s1 + $0x148] sm:$0xff]   ;;  %v4949_v18 = vld [vmem:[%s6642_s1 + $0x140] sm:$0xff]   ;;  %v4952_v63 = vld [vmem:[%s6642_s1 + $0x238] sm:$0xff]  }
  0x87   : > { %4589 = vmatprep.subr.bf16.mxu0 %v4933_v51 }
  0x88   : > { %4460 = vmatmul.mubr.bf16.gmra.mxu1 %v5794_v11  ;;  %v2243_v59 = vsel %vm5535_vm5, %v2241_v3, %v2242_v62  ;;  %v4951_v3 = vld [vmem:[%s6642_s1 + $0x1f8] sm:$0xff]   ;;  %v6720_v62 = vld [vmem:[#allocation13_spill] sm:$0xff] }
  0x89   : > { %4463 = vmatprep.mubr.bf16.mxu1 %v5804_v55  ;;  %4540 = vmatpush3.bf16.msra.mxu1 %v4928_v5  ;;  %v5870_v42 = vcombine.low %v2240_v16, %v2243_v59  ;;  %v4941_v5 = vld [vmem:[%s6642_s1 + $0x1a0] sm:$0xff]   ;;  %v1951_v59 = vshrl.u32 %v5857_v44, 16 }
  0x8a   : > { %4541 = vmatprep.subr.bf16.mxu1 %v4932_v4  ;;  %4590 = vmatpush3.bf16.msra.mxu0 %v4933_v51  ;;  %v4942_v51 = vld [vmem:[%s6642_s1 + $0x158] sm:$0xff]  }
  0x8b   : > { %4671 = vmatprep.subr.bf16.mxu0 %v4935_v38  ;;  %v6721_v16 = vld [vmem:[#allocation15_spill] sm:$0xff] }
  0x8c   : > { %4512 = vmatmul.mubr.bf16.gmra.mxu0 %v5827_v53 }
  0x8d   : > { %4542 = vmatpush3.bf16.msra.mxu1 %v4932_v4  ;;  %4515 = vmatprep.mubr.bf16.mxu0 %v5829_v41  ;;  %v4944_v4 = vld [vmem:[%s6642_s1 + $0x150] sm:$0xff]  }
  0x8e   : > { %4623 = vmatprep.subr.bf16.mxu1 %v4934_v7 }
  0x90   : > { %4464 = vmatmul.mubr.bf16.gmra.mxu1 %v5835_v0 }
  0x91   : > { %4467 = vmatprep.mubr.bf16.mxu1 %v5839_v14 }
  0x94   : > { %4516 = vmatmul.mubr.bf16.gmra.mxu0 %v5727_v47 }
  0x95   : > { %4519 = vmatprep.mubr.bf16.mxu0 %v5748_v15 }
  0x98   : > { %4468 = vmatmul.mubr.bf16.gmra.mxu1 %v5688_v25 }
  0x99   : > { %4471 = vmatprep.mubr.bf16.mxu1 %v5703_v17 }
  0x9c   : > { %4520 = vmatmul.mubr.bf16.gmra.mxu0 %v5757_v26 }
  0x9d   : > { %4523 = vmatprep.mubr.bf16.mxu0 %v5785_v6 }
  0xa0   : > { %4472 = vmatmul.mubr.bf16.gmra.mxu1 %v5718_v34 }
  0xa1   : > { %4475 = vmatprep.mubr.bf16.mxu1 %v5736_v39 }
  0xa4   : > { %4524 = vmatmul.mubr.bf16.gmra.mxu0 %v5796_v9 }
  0xa5   : > { %4591 = vmatprep.mubr.bf16.mxu0 %v6712_v60  ;;  %v1954_v60 = vshll.u32 %v5857_v44, 16 }
  0xa8   : > { %4476 = vmatmul.mubr.bf16.gmra.mxu1 %v5754_v19 }
  0xa9   : > { %4543 = vmatprep.mubr.bf16.mxu1 %v5234_v22  ;;  %v4938_v22 = vld [vmem:[%s6642_s1 + $0x168] sm:$0xff]  }
  0xac   : > { %4592 = vmatmul.mubr.bf16.vlgmr.msra.gmra.mxu0 %v6713_v10 }
  0xad   : > { %4672 = vmatpush3.bf16.msra.mxu0 %v4935_v38  ;;  %4595 = vmatprep.mubr.bf16.mxu0 %v6714_v52  ;;  %v4950_v38 = vld [vmem:[%s6642_s1 + $0x180] sm:$0xff]  }
  0xae   : > { %4673 = vmatprep.subr.bf16.mxu0 %v4937_v54 }
  0xb0   : > { %4544 = vmatmul.mubr.bf16.vlgmr.msra.gmra.mxu1 %v5560_v33 }
  0xb1   : > { %4624 = vmatpush3.bf16.msra.mxu1 %v4934_v7  ;;  %4547 = vmatprep.mubr.bf16.mxu1 %v5642_v43  ;;  %v6718_v7 = vld [vmem:[#allocation9_spill] sm:$0xff] }
  0xb2   : > { %4625 = vmatprep.subr.bf16.mxu1 %v4936_v32  ;;  %4674 = vmatpush3.bf16.msra.mxu0 %v4937_v54  ;;  %v1964_v54 = vshrl.u32 %v5852_v36, 16 }
  0xb3   : > { %4675 = vmatprep.subr.bf16.mxu0 %v4939_v40 }
  0xb4   : > { %4596 = vmatmul.mubr.bf16.gmra.mxu0 %v6715_v21 }
  0xb5   : > { %4626 = vmatpush3.bf16.msra.mxu1 %v4936_v32  ;;  %4599 = vmatprep.mubr.bf16.mxu0 %v6716_v35  ;;  %v1960_v32 = vshll.u32 %v5852_v36, 16 }
  0xb6   : > { %4627 = vmatprep.subr.bf16.mxu1 %v4938_v22  ;;  %4676 = vmatpush3.bf16.msra.mxu0 %v4939_v40  ;;  %v1953_v40 = vrot.slane %v1951_v59, 4 }
  0xb7   : > { %4677 = vmatprep.subr.bf16.mxu0 %v4941_v5 }
  0xb8   : > { %4548 = vmatmul.mubr.bf16.gmra.mxu1 %v5650_v50 }
  0xb9   : > { %4551 = vmatprep.mubr.bf16.mxu1 %v5654_v8  ;;  %4628 = vmatpush3.bf16.msra.mxu1 %v4938_v22  ;;  %v1956_v22 = vrot.slane %v1954_v60, 5 }
  0xba   : > { %4629 = vmatprep.subr.bf16.mxu1 %v4940_v27  ;;  %4678 = vmatpush3.bf16.msra.mxu0 %v4941_v5  ;;  %v1962_v5 = vrot.slane %v1960_v32, 5  ;;  %v4954_v32 = vld [vmem:[%s6642_s1 + $0x230] sm:$0xff]  }
  0xbb   : > { %4679 = vmatprep.subr.bf16.mxu0 %v4943_v23 }
  0xbc   : > { %4600 = vmatmul.mubr.bf16.gmra.mxu0 %v6717_v24 }
  0xbd   : > { %4630 = vmatpush3.bf16.msra.mxu1 %v4940_v27  ;;  %4603 = vmatprep.mubr.bf16.mxu0 %v5550_v20  ;;  %v1966_v27 = vrot.slane %v1964_v54, 4  ;;  %v5963_v54 = vcombine.low %v5857_v44, %v5852_v36  ;;  %v4953_v36 = vld [vmem:[%s6642_s1 + $0x1f0] sm:$0xff]  }
  0xbe   : > { %4631 = vmatprep.subr.bf16.mxu1 %v4942_v51  ;;  %4680 = vmatpush3.bf16.msra.mxu0 %v4943_v23  ;;  %v6722_v23 = vld [vmem:[#allocation17_spill] sm:$0xff] }
  0xbf   : > { %4681 = vmatprep.subr.bf16.mxu0 %v4945_v1 }
  0xc0   : > { %4552 = vmatmul.mubr.bf16.gmra.mxu1 %v5658_v57 }
  0xc1   : > { %4555 = vmatprep.mubr.bf16.mxu1 %v5794_v11  ;;  %4632 = vmatpush3.bf16.msra.mxu1 %v4942_v51  ;;  %v6723_v51 = vld [vmem:[#allocation22_spill] sm:$0xff] }
  0xc2   : > { %4633 = vmatprep.subr.bf16.mxu1 %v4944_v4  ;;  %4682 = vmatpush3.bf16.msra.mxu0 %v4945_v1  ;;  %v1957_v1 = vor.u32 %v1956_v22, %v1953_v40  ;;  %v4962_v22 = vld [vmem:[%s6642_s1 + $0x210] sm:$0xff]  }
  0xc3   : > { %4683 = vmatprep.subr.bf16.mxu0 %v4947_v13 }
  0xc4   : > { %4604 = vmatmul.mubr.bf16.gmra.mxu0 %v6718_v7 }
  0xc5   : > { %4634 = vmatpush3.bf16.msra.mxu1 %v4944_v4  ;;  %4607 = vmatprep.mubr.bf16.mxu0 %v6719_v48  ;;  %v1967_v4 = vor.u32 %v1966_v27, %v1962_v5  ;;  %v4961_v27 = vld [vmem:[%s6642_s1 + $0x1d0] sm:$0xff]  }
  0xc6   : > { %4635 = vmatprep.subr.bf16.mxu1 %v4946_v30  ;;  %4684 = vmatpush3.bf16.msra.mxu0 %v4947_v13  ;;  %v1970_v13 = vshll.u32 %v5860_v31, 16 }
  0xc7   : > { %4685 = vmatprep.subr.bf16.mxu0 %v4950_v38 }
  0xc8   : > { %4556 = vmatmul.mubr.bf16.gmra.mxu1 %v5804_v55 }
  0xc9   : > { %4559 = vmatprep.mubr.bf16.mxu1 %v5835_v0  ;;  %4636 = vmatpush3.bf16.msra.mxu1 %v4946_v30  ;;  %v1958_v30 = vrot.slane %v1957_v1, 4 }
  0xca   : > { %4637 = vmatprep.subr.bf16.mxu1 %v4949_v18  ;;  %4686 = vmatpush3.bf16.msra.mxu0 %v4950_v38  ;;  %v1968_v38 = vrot.slane %v1967_v4, 4 }
  0xcb   : > { %4767 = vmatprep.subr.bf16.mxu0 %v4952_v63  ;;  %v1963_v59 = vsel %vm5189_vm2, %v1958_v30, %v1962_v5  ;;  %v4967_v30 = vld [vmem:[%s6642_s1 + $0x200] sm:$0xff]  }
  0xcc   : > { %4608 = vmatmul.mubr.bf16.gmra.mxu0 %v6720_v62 }
  0xcd   : > { %4638 = vmatpush3.bf16.msra.mxu1 %v4949_v18  ;;  %4611 = vmatprep.mubr.bf16.mxu0 %v6721_v16  ;;  %v1972_v18 = vrot.slane %v1970_v13, 5 }
  0xce   : > { %4719 = vmatprep.subr.bf16.mxu1 %v4951_v3 }
  0xcf   : > { %v1973_v60 = vsel %vm5189_vm2, %v1968_v38, %v1972_v18  ;;  %v4966_v18 = vld [vmem:[%s6642_s1 + $0x1c0] sm:$0xff]  }
  0xd0   : > { %4560 = vmatmul.mubr.bf16.gmra.mxu1 %v5839_v14  ;;  %v5959_v31 = vcombine.low %v1963_v59, %v1973_v60 }
  0xd1   : > { %4563 = vmatprep.mubr.bf16.mxu1 %v5688_v25 }
  0xd2   : > { %6725 = vst [vmem:[#allocation20_spill] sm:$0xff] %v5959_v31 }
  0xd4   : > { %4612 = vmatmul.mubr.bf16.gmra.mxu0 %v6722_v23 }
  0xd5   : > { %4615 = vmatprep.mubr.bf16.mxu0 %v6723_v51 }
  0xd8   : > { %4564 = vmatmul.mubr.bf16.gmra.mxu1 %v5703_v17 }
  0xd9   : > { %4567 = vmatprep.mubr.bf16.mxu1 %v5718_v34 }
  0xdc   : > { %4616 = vmatmul.mubr.bf16.gmra.mxu0 %v6724_v58 }
  0xdd   : > { %4619 = vmatprep.mubr.bf16.mxu0 %v5569_v61 }
  0xe0   : > { %4568 = vmatmul.mubr.bf16.gmra.mxu1 %v5736_v39 }
  0xe1   : > { %4571 = vmatprep.mubr.bf16.mxu1 %v5754_v19 }
  0xe4   : > { %4620 = vmatmul.mubr.bf16.gmra.mxu0 %v5959_v31 }
  0xe5   : > { %4687 = vmatprep.mubr.bf16.mxu0 %v5560_v33  ;;  %v4956_v33 = vld [vmem:[%s6642_s1 + $0x228] sm:$0xff]  }
  0xe8   : > { %4572 = vmatmul.mubr.bf16.gmra.mxu1 %v5963_v54 }
  0xe9   : > { %4639 = vmatprep.mubr.bf16.mxu1 %v5585_v12  ;;  %v4955_v12 = vld [vmem:[%s6642_s1 + $0x1e8] sm:$0xff]  }
  0xec   : > { %4688 = vmatmul.mubr.bf16.vlgmr.msra.gmra.mxu0 %v5642_v43  ;;  %v4958_v43 = vld [vmem:[%s6642_s1 + $0x220] sm:$0xff]  }
  0xed   : > { %4768 = vmatpush3.bf16.msra.mxu0 %v4952_v63  ;;  %4691 = vmatprep.mubr.bf16.mxu0 %v5650_v50  ;;  %v4957_v50 = vld [vmem:[%s6642_s1 + $0x1e0] sm:$0xff]  }
  0xee   : > { %4769 = vmatprep.subr.bf16.mxu0 %v4954_v32 }
  0xf0   : > { %4640 = vmatmul.mubr.bf16.vlgmr.msra.gmra.mxu1 %v5590_v28 }
  0xf1   : > { %4720 = vmatpush3.bf16.msra.mxu1 %v4951_v3  ;;  %4643 = vmatprep.mubr.bf16.mxu1 %v5623_v49  ;;  %v4959_v3 = vld [vmem:[%s6642_s1 + $0x1d8] sm:$0xff]  }
  0xf2   : > { %4721 = vmatprep.subr.bf16.mxu1 %v4953_v36  ;;  %4770 = vmatpush3.bf16.msra.mxu0 %v4954_v32 }
  0xf3   : > { %4771 = vmatprep.subr.bf16.mxu0 %v4956_v33 }
  0xf4   : > { %4692 = vmatmul.mubr.bf16.gmra.mxu0 %v5654_v8  ;;  %v4960_v8 = vld [vmem:[%s6642_s1 + $0x218] sm:$0xff]  }
  0xf5   : > { %4722 = vmatpush3.bf16.msra.mxu1 %v4953_v36  ;;  %4695 = vmatprep.mubr.bf16.mxu0 %v5658_v57 }
  0xf6   : > { %4723 = vmatprep.subr.bf16.mxu1 %v4955_v12  ;;  %v5993_v44 = vpop.f32.mrf.mxu0  ;;  %4772 = vmatpush3.bf16.msra.mxu0 %v4956_v33  ;;  %v5996_v63 = vpop.f32.mrf.mxu1 }
  0xf7   : > { %4773 = vmatprep.subr.bf16.mxu0 %v4958_v43 }
  0xf8   : > { %4644 = vmatmul.mubr.bf16.gmra.mxu1 %v5625_v45  ;;  %v6002_v57 = vpop.f32.mrf.mxu0  ;;  %v6007_v40 = vpop.f32.mrf.mxu1 }
  0xf9   : > { %4647 = vmatprep.mubr.bf16.mxu1 %v5671_v2  ;;  %4724 = vmatpush3.bf16.msra.mxu1 %v4955_v12 }
  0xfa   : > { %4725 = vmatprep.subr.bf16.mxu1 %v4957_v50  ;;  %4774 = vmatpush3.bf16.msra.mxu0 %v4958_v43  ;;  %v6013_v5 = vpop.f32.mrf.mxu0  ;;  %v6020_v1 = vpop.f32.mrf.mxu1 }
  0xfb   : > { %4775 = vmatprep.subr.bf16.mxu0 %v4960_v8 }
  0xfc   : > { %4696 = vmatmul.mubr.bf16.gmra.mxu0 %v5794_v11  ;;  %v4964_v11 = vld [vmem:[%s6642_s1 + $0x208] sm:$0xff]   ;;  %v6026_v4 = vpop.f32.mrf.mxu0  ;;  %v6031_v13 = vpop.f32.mrf.mxu1 }
  0xfd   : > { %4726 = vmatpush3.bf16.msra.mxu1 %v4957_v50  ;;  %4699 = vmatprep.mubr.bf16.mxu0 %v5804_v55  ;;  %v4963_v55 = vld [vmem:[%s6642_s1 + $0x1c8] sm:$0xff]  }
  0xfe   : > { %4727 = vmatprep.subr.bf16.mxu1 %v4959_v3  ;;  %4776 = vmatpush3.bf16.msra.mxu0 %v4960_v8  ;;  %v6083_v8 = vld [vmem:[%s5155_s7 + $0xd0] sm:$0xf] }
  0xff   : > { %4777 = vmatprep.subr.bf16.mxu0 %v4962_v22 }
 0x100   : > { %4648 = vmatmul.mubr.bf16.gmra.mxu1 %v5679_v56 }
 0x101   : > { %4651 = vmatprep.mubr.bf16.mxu1 %v5764_v46  ;;  %4728 = vmatpush3.bf16.msra.mxu1 %v4959_v3 }
 0x102   : > { %4729 = vmatprep.subr.bf16.mxu1 %v4961_v27  ;;  %4778 = vmatpush3.bf16.msra.mxu0 %v4962_v22  ;;  %v6037_v38 = vpop.f32.mrf.mxu0 }
 0x103   : > { %4779 = vmatprep.subr.bf16.mxu0 %v4964_v11 }
 0x104   : > { %4700 = vmatmul.mubr.bf16.gmra.mxu0 %v5835_v0  ;;  %v6047_v60 = vpop.f32.mrf.mxu0 }
 0x105   : > { %4730 = vmatpush3.bf16.msra.mxu1 %v4961_v27  ;;  %4703 = vmatprep.mubr.bf16.mxu0 %v5839_v14  ;;  %v6044_v59 = vpop.f32.mrf.mxu1 }
 0x106   : > { %4731 = vmatprep.subr.bf16.mxu1 %v4963_v55  ;;  %4780 = vmatpush3.bf16.msra.mxu0 %v4964_v11  ;;  %v6052_v14 = vpop.f32.mrf.mxu0 }
 0x107   : > { %4781 = vmatprep.subr.bf16.mxu0 %v4967_v30  ;;  %v6049_v0 = vpop.f32.mrf.mxu1 }
 0x108   : > { %4652 = vmatmul.mubr.bf16.gmra.mxu1 %v5777_v37  ;;  %v6059_v36 = vpop.f32.mrf.mxu0 }
 0x109   : > { %4655 = vmatprep.mubr.bf16.mxu1 %v5827_v53  ;;  %4732 = vmatpush3.bf16.msra.mxu1 %v4963_v55  ;;  %v6056_v32 = vpop.f32.mrf.mxu1 }
 0x10a   : > { %4733 = vmatprep.subr.bf16.mxu1 %v4966_v18  ;;  %4782 = vmatpush3.bf16.msra.mxu0 %v4967_v30 }
 0x10b   : > { %v6061_v33 = vpop.f32.mrf.mxu1 }
 0x10c   : > { %4704 = vmatmul.mubr.bf16.gmra.mxu0 %v5688_v25 }
 0x10d   : > { %4734 = vmatpush3.bf16.msra.mxu1 %v4966_v18  ;;  %4707 = vmatprep.mubr.bf16.mxu0 %v5703_v17 }
 0x110   : > { %4656 = vmatmul.mubr.bf16.gmra.mxu1 %v5829_v41 }
 0x111   : > { %4659 = vmatprep.mubr.bf16.mxu1 %v5727_v47 }
 0x112   : > { %v6064_v25 = vpop.f32.mrf.mxu0 }
 0x114   : > { %4708 = vmatmul.mubr.bf16.gmra.mxu0 %v5718_v34  ;;  %v6071_v12 = vpop.f32.mrf.mxu0  ;;  %v6080_v34 = vld [vmem:[%s5155_s7 + $0xcc] sm:$0xf] }
 0x115   : > { %4711 = vmatprep.mubr.bf16.mxu0 %v5736_v39  ;;  %v3940_v22 = vcombine.low %v6080_v34, %v6083_v8 }
 0x116   : > { %v6076_v50 = vpop.f32.mrf.mxu0 }
 0x117   : > { %v6068_v17 = vpop.f32.mrf.mxu1 }
 0x118   : > { %4660 = vmatmul.mubr.bf16.gmra.mxu1 %v5748_v15  ;;  %6726 = vst [vmem:[#allocation18_spill] sm:$0xff] %v6068_v17  ;;  %v6088_v3 = vpop.f32.mrf.mxu0 }
 0x119   : > { %4663 = vmatprep.mubr.bf16.mxu1 %v5757_v26  ;;  %v6073_v43 = vpop.f32.mrf.mxu1 }
 0x11a   : > { %6727 = vst [vmem:[#allocation21_spill] sm:$0xff] %v6073_v43 }
 0x11b   : > { %v6086_v39 = vpop.f32.mrf.mxu1 }
 0x11c   : > { %4712 = vmatmul.mubr.bf16.gmra.mxu0 %v5754_v19  ;;  %6728 = vst [vmem:[#allocation24_spill] sm:$0xff] %v6086_v39 }
 0x11d   : > { %4715 = vmatprep.mubr.bf16.mxu0 %v5963_v54  ;;  %v6093_v19 = vpop.f32.mrf.mxu1 }
 0x11e   : > { %6729 = vst [vmem:[#allocation10_spill] sm:$0xff] %v6093_v19 }
 0x120   : > { %4664 = vmatmul.mubr.bf16.gmra.mxu1 %v5785_v6 }
 0x121   : > { %4667 = vmatprep.mubr.bf16.mxu1 %v5796_v9 }
 0x124   : > { %v6095_v27 = vpop.f32.mrf.mxu0  ;;  %4716 = vmatmul.mubr.bf16.gmra.mxu0 %v3940_v22 }
 0x125   : > { %4783 = vmatprep.mubr.bf16.mxu0 %v5590_v28 }
 0x126   : > { %v6098_v54 = vpop.f32.mrf.mxu0 }
 0x128   : > { %v6100_v11 = vpop.f32.mrf.mxu1  ;;  %4668 = vmatmul.mubr.bf16.gmra.mxu1 %v5870_v42  ;;  %v6103_v55 = vpop.f32.mrf.mxu0 }
 0x129   : > { %6730 = vst [vmem:[#allocation12_spill] sm:$0xff] %v6100_v11  ;;  %4735 = vmatprep.mubr.bf16.mxu1 %v6713_v10 }
 0x12a   : > { %v6106_v30 = vpop.f32.mrf.mxu1  ;;  %v6108_v18 = vpop.f32.mrf.mxu0 }
 0x12b   : > { %6731 = vst [vmem:[#allocation14_spill] sm:$0xff] %v6106_v30 }
 0x12c   : > { %v6110_v19 = vpop.f32.mrf.mxu1  ;;  %v4497_v39 = vpop.f32.mrf.mxu0  ;;  %4784 = vmatmul.mubr.bf16.vlgmr.msra.gmra.mxu0 %v5623_v49 }
 0x12d   : > { %6732 = vst [vmem:[#allocation16_spill] sm:$0xff] %v6110_v19  ;;  %4787 = vmatprep.mubr.bf16.mxu0 %v5625_v45 }
 0x12e   : > { %v6113_v28 = vpop.f32.mrf.mxu1  ;;  %v1527_v22 = vpop.f32.mrf.mxu0 }
 0x12f   : > { %6733 = vst [vmem:[#allocation19_spill] sm:$0xff] %v6113_v28 }
 0x130   : > { %v4449_v11 = vpop.f32.mrf.mxu1  ;;  %4736 = vmatmul.mubr.bf16.vlgmr.msra.gmra.mxu1 %v6714_v52  ;;  %v4498_v10 = vpop.f32.mrf.mxu0 }
 0x131   : > { %v1115_v43 = vadd.f32 %v4449_v11, %v5993_v44  ;;  %4739 = vmatprep.mubr.bf16.mxu1 %v6715_v21 }
 0x132   : > { %v1106_v30 = vpop.f32.mrf.mxu1  ;;  %v1530_v17 = vpop.f32.mrf.mxu0 }
 0x133   : > { %v6119_v31 = vadd.f32 %v4497_v39, %v1115_v43  ;;  %v1107_v19 = vadd.f32 %v1106_v30, %v6002_v57 }
 0x134   : > { %v4450_v49 = vpop.f32.mrf.mxu1  ;;  %v4501_v28 = vpop.f32.mrf.mxu0  ;;  %4788 = vmatmul.mubr.bf16.gmra.mxu0 %v5671_v2 }
 0x135   : > { %v6122_v29 = vadd.f32 %v1527_v22, %v1107_v19  ;;  %v1118_v45 = vadd.f32 %v4450_v49, %v6013_v5  ;;  %4791 = vmatprep.mubr.bf16.mxu0 %v5679_v56 }
 0x136   : > { %v1109_v52 = vpop.f32.mrf.mxu1  ;;  %v1543_v43 = vpop.f32.mrf.mxu0 }
 0x137   : > { %v6127_v44 = vadd.f32 %v4498_v10, %v1118_v45  ;;  %v1110_v21 = vadd.f32 %v1109_v52, %v6026_v4 }
 0x138   : > { %v4453_v39 = vpop.f32.mrf.mxu1  ;;  %4740 = vmatmul.mubr.bf16.gmra.mxu1 %v6716_v35  ;;  %v4502_v11 = vpop.f32.mrf.mxu0 }
 0x139   : > { %v6131_v57 = vadd.f32 %v1530_v17, %v1110_v21  ;;  %v1131_v19 = vadd.f32 %v4453_v39, %v6037_v38  ;;  %4743 = vmatprep.mubr.bf16.mxu1 %v6717_v24 }
 0x13a   : > { %v1122_v5 = vpop.f32.mrf.mxu1  ;;  %v1546_v30 = vpop.f32.mrf.mxu0 }
 0x13b   : > { %v6135_v2 = vadd.f32 %v4501_v28, %v1131_v19  ;;  %v1123_v56 = vadd.f32 %v1122_v5, %v6047_v60 }
 0x13c   : > { %v4454_v22 = vpop.f32.mrf.mxu1  ;;  %v4505_v49 = vpop.f32.mrf.mxu0  ;;  %4792 = vmatmul.mubr.bf16.gmra.mxu0 %v5764_v46 }
 0x13d   : > { %v6138_v10 = vadd.f32 %v1543_v43, %v1123_v56  ;;  %v1134_v4 = vadd.f32 %v4454_v22, %v6052_v14  ;;  %4795 = vmatprep.mubr.bf16.mxu0 %v5777_v37 }
 0x13e   : > { %v1125_v35 = vpop.f32.mrf.mxu1  ;;  %v1559_v17 = vpop.f32.mrf.mxu0 }
 0x13f   : > { %v6143_v38 = vadd.f32 %v4502_v11, %v1134_v4  ;;  %v1126_v24 = vadd.f32 %v1125_v35, %v6059_v36 }
 0x140   : > { %v4457_v28 = vpop.f32.mrf.mxu1  ;;  %4744 = vmatmul.mubr.bf16.gmra.mxu1 %v5550_v20  ;;  %v4506_v52 = vpop.f32.mrf.mxu0 }
 0x141   : > { %v6147_v60 = vadd.f32 %v1546_v30, %v1126_v24  ;;  %v1147_v45 = vadd.f32 %v4457_v28, %v6064_v25  ;;  %4747 = vmatprep.mubr.bf16.mxu1 %v6718_v7 }
 0x142   : > { %v1138_v14 = vpop.f32.mrf.mxu1  ;;  %v1562_v21 = vpop.f32.mrf.mxu0 }
 0x143   : > { %v6151_v46 = vadd.f32 %v4505_v49, %v1147_v45  ;;  %v1139_v37 = vadd.f32 %v1138_v14, %v6071_v12  ;;  %v2784_v45 = vshrl.u32 %v6083_v8, 16 }
 0x144   : > { %v4458_v43 = vpop.f32.mrf.mxu1  ;;  %v4509_v19 = vpop.f32.mrf.mxu0  ;;  %4796 = vmatmul.mubr.bf16.gmra.mxu0 %v5827_v53 }
 0x145   : > { %v6154_v39 = vadd.f32 %v1559_v17, %v1139_v37  ;;  %v1150_v36 = vadd.f32 %v4458_v43, %v6076_v50  ;;  %4799 = vmatprep.mubr.bf16.mxu0 %v5829_v41  ;;  %v2771_v17 = vshrl.u32 %v6080_v34, 16 }
 0x146   : > { %v1141_v20 = vpop.f32.mrf.mxu1  ;;  %v1575_v11 = vpop.f32.mrf.mxu0 }
 0x147   : > { %v6159_v25 = vadd.f32 %v4506_v52, %v1150_v36  ;;  %v1142_v7 = vadd.f32 %v1141_v20, %v6088_v3  ;;  %v2773_v43 = vrot.slane %v2771_v17, 4  ;;  %v2786_v20 = vrot.slane %v2784_v45, 4 }
 0x148   : > { %v4461_v5 = vpop.f32.mrf.mxu1  ;;  %4748 = vmatmul.mubr.bf16.gmra.mxu1 %v6719_v48  ;;  %v4510_v30 = vpop.f32.mrf.mxu0 }
 0x149   : > { %v6163_v12 = vadd.f32 %v1562_v21, %v1142_v7  ;;  %v1163_v56 = vadd.f32 %v4461_v5, %v6095_v27  ;;  %4751 = vmatprep.mubr.bf16.mxu1 %v6720_v62 }
 0x14a   : > { %v1154_v50 = vpop.f32.mrf.mxu1  ;;  %v1578_v22 = vpop.f32.mrf.mxu0 }
 0x14b   : > { %v6167_v53 = vadd.f32 %v4509_v19, %v1163_v56  ;;  %v1155_v41 = vadd.f32 %v1154_v50, %v6098_v54  ;;  %v2774_v54 = vshll.u32 %v6080_v34, 16  ;;  %v234_v56 = vld [vmem:[%s5155_s7 + $0xd4] sm:$0x1]  ;;  %s6473_s7 = sand.u32 1, %s5059_s13  }
 0x14c   : > { %v4462_v4 = vpop.f32.mrf.mxu1  ;;  %v4513_v35 = vpop.f32.mrf.mxu0  ;;  %4800 = vmatmul.mubr.bf16.gmra.mxu0 %v5727_v47  ;;  %s3725_s10 = sshll.u32 %s6473_s7, 7  ;;  %s3596_s26 = scalar_lea.sflag [#allocation3], %s6473_s7 }
 0x14d   : > { %v6170_v49 = vadd.f32 %v1575_v11, %v1155_v41  ;;  %v1166_v3 = vadd.f32 %v4462_v4, %v6103_v55  ;;  %4803 = vmatprep.mubr.bf16.mxu0 %v5748_v15  ;;  %v2780_v55 = vshll.u32 %v6083_v8, 16  ;;  %s6489_s11 = scalar_lea.vmem [#allocation2], %s3725_s10 }
 0x14e   : > { %v1157_v48 = vpop.f32.mrf.mxu1  ;;  %v1591_v24 = vpop.f32.mrf.mxu0  ;;  %s3614_s19 = sshll.u32 %s6489_s11, 4  ;;  %s6573_s19 = int_to_ptr.vmem [resolvable:$true] %s3614_s19 }
 0x14f   : > { %v6175_v27 = vadd.f32 %v4510_v30, %v1166_v3  ;;  %v1158_v62 = vadd.f32 %v1157_v48, %v6108_v18  ;;  %v2782_v19 = vrot.slane %v2780_v55, 5  ;;  %v2790_v3 = vshll.u32 %v234_v56, 16  ;;  %s4977_s27 = scalar_lea.vmem %s6573_s19, 2048  ;;  %p4984_p0 = scmp.lt.s32.totalorder %s6573_s19, %s4982_s29 }
 0x150   : > { %v4465_v28 = vpop.f32.mrf.mxu1  ;;  %4752 = vmatmul.mubr.bf16.gmra.mxu1 %v6721_v16  ;;  %v4514_v52 = vpop.f32.mrf.mxu0  ;;  %v2776_v16 = vrot.slane %v2774_v54, 5  ;;  %p4978_p11 = scmp.ne.s32.totalorder %s6573_s19, %s4977_s27  ;;  %p4985_p1 = scmp.lt.s32.totalorder %s4983_s30, %s4977_s27 }
 0x151   : > { %v6183_v47 = vadd.f32 %v1578_v22, %v1158_v62  ;;  %v1179_v15 = vadd.f32 %v4465_v28, %v5996_v63  ;;  %4755 = vmatprep.mubr.bf16.mxu1 %v6722_v23  ;;  %v3059_v23 = vrot.slane %v6083_v8, 5  ;;  %v2787_v8 = vor.u32 %v2786_v20, %v2782_v19 }
 0x152   : > { %v1170_v18 = vpop.f32.mrf.mxu1  ;;  %v1594_v21 = vpop.f32.mrf.mxu0  ;;  %v2777_v22 = vor.u32 %v2776_v16, %v2773_v43  ;;  %v3062_v62 = vrot.slane %v234_v56, 5  ;;  %v2792_v45 = vrot.slane %v2790_v3, 5  ;;  %v6738_v56 = vld [vmem:[#allocation21_spill] sm:$0xff]  ;;  %p4979_p12 = pnand %p4978_p11, %p5131_p5  ;;  %p4986_p2 = por %p4985_p1, %p4984_p0 }
 0x153   : > { %v6187_v14 = vadd.f32 %v4513_v35, %v1179_v15  ;;  %v1171_v37 = vadd.f32 %v1170_v18, %v6007_v40  ;;  %v3061_v48 = vrot.slane %v3059_v23, 4 }
 0x154   : > { %v4466_v36 = vpop.f32.mrf.mxu1  ;;  %v4517_v63 = vpop.f32.mrf.mxu0  ;;  %4804 = vmatmul.mubr.bf16.gmra.mxu0 %v5757_v26  ;;  %v2778_v54 = vrot.slane %v2777_v22, 4  ;;  %v6739_v22 = vld [vmem:[#allocation24_spill] sm:$0xff]  ;;  %p4980_p13 = pneg %p4979_p12 }
 0x155   : > { %v6190_v7 = vadd.f32 %v1591_v24, %v1171_v37  ;;  %v1182_v11 = vadd.f32 %v4466_v36, %v6020_v1  ;;  %4807 = vmatprep.mubr.bf16.mxu0 %v5785_v6  ;;  %v3974_v6 = vrot.slane %v6080_v34, 9 }
 0x156   : > { %v1173_v5 = vpop.f32.mrf.mxu1  ;;  %v1607_v50 = vpop.f32.mrf.mxu0  ;;  %v2783_v43 = vsel %vm5189_vm2, %v2778_v54, %v2782_v19  ;;  %p4987_p3 = pnand %p4986_p2, %p4980_p13 }
 0x157   : > { %v6197_v40 = vadd.f32 %v4514_v52, %v1182_v11  ;;  %v1174_v30 = vadd.f32 %v1173_v5, %v6031_v13  ;;  %v3060_v52 = vsel %vm5535_vm5, %v3974_v6, %v3059_v23  ;;  %v6737_v11 = vld [vmem:[#allocation20_spill] sm:$0xff]  ;;  %v6740_v6 = vld [vmem:[#allocation10_spill] sm:$0xff] }
 0x158   : > { %v4469_v41 = vpop.f32.mrf.mxu1  ;;  %4756 = vmatmul.mubr.bf16.gmra.mxu1 %v6723_v51  ;;  %v4518_v26 = vpop.f32.mrf.mxu0 }
 0x159   : > { %v6201_v4 = vadd.f32 %v1594_v21, %v1174_v30  ;;  %v1195_v1 = vadd.f32 %v4469_v41, %v6044_v59  ;;  %4759 = vmatprep.mubr.bf16.mxu1 %v6724_v58  ;;  %v2788_v58 = vrot.slane %v2787_v8, 4 }
 0x15a   : > { %v1186_v35 = vpop.f32.mrf.mxu1  ;;  %v1610_v51 = vpop.f32.mrf.mxu0 }
 0x15b   : > { %v6206_v13 = vadd.f32 %v4517_v63, %v1195_v1  ;;  %v1187_v24 = vadd.f32 %v1186_v35, %v6049_v0  ;;  %v3063_v0 = vsel %vm5535_vm5, %v3061_v48, %v3062_v62  ;;  %v2793_v63 = vsel %vm5189_vm2, %v2788_v58, %v2792_v45  ;;  %v6742_v58 = vld [vmem:[#allocation14_spill] sm:$0xff] }
 0x15c   : > { %v4470_v17 = vpop.f32.mrf.mxu1  ;;  %v4521_v55 = vpop.f32.mrf.mxu0  ;;  %4808 = vmatmul.mubr.bf16.gmra.mxu0 %v5796_v9  ;;  %v3991_v23 = vcombine.low %v3060_v52, %v3063_v0  ;;  %v3965_v41 = vcombine.low %v2783_v43, %v2793_v63  ;;  %v6743_v0 = vld [vmem:[#allocation16_spill] sm:$0xff]  ;;  %v6744_v43 = vld [vmem:[#allocation19_spill] sm:$0xff] }
 0x15d   : > { %v6209_v28 = vadd.f32 %v1607_v50, %v1187_v24  ;;  %v1198_v59 = vadd.f32 %v4470_v17, %v6056_v32  ;;  %4811 = vmatprep.mubr.bf16.mxu0 %v5870_v42  ;;  %v6736_v42 = vld [vmem:[#allocation18_spill] sm:$0xff] }
 0x15e   : > { %v1189_v34 = vpop.f32.mrf.mxu1  ;;  %v1623_v21 = vpop.f32.mrf.mxu0 }
 0x15f   : > { %v6218_v18 = vadd.f32 %v4518_v26, %v1198_v59  ;;  %v1190_v37 = vadd.f32 %v1189_v34, %v6061_v33 }
 0x160   : > { %v4473_v32 = vpop.f32.mrf.mxu1  ;;  %4760 = vmatmul.mubr.bf16.gmra.mxu1 %v5569_v61  ;;  %v4522_v20 = vpop.f32.mrf.mxu0 }
 0x161   : > { %v6224_v16 = vadd.f32 %v1610_v51, %v1190_v37  ;;  %v1211_v36 = vadd.f32 %v4473_v32, %v6736_v42  ;;  %4763 = vmatprep.mubr.bf16.mxu1 %v6737_v11  ;;  %v6741_v51 = vld [vmem:[#allocation12_spill] sm:$0xff] }
 0x162   : > { %v1202_v5 = vpop.f32.mrf.mxu1  ;;  %v1626_v61 = vpop.f32.mrf.mxu0 }
 0x163   : > { %v6230_v33 = vadd.f32 %v4521_v55, %v1211_v36  ;;  %v1203_v30 = vadd.f32 %v1202_v5, %v6738_v56 }
 0x164   : > { %v4474_v50 = vpop.f32.mrf.mxu1  ;;  %v4525_v26 = vpop.f32.mrf.mxu0  ;;  %4812 = vmatmul.mubr.bf16.gmra.mxu0 %v3991_v23 }
 0x165   : > { %v6233_v19 = vadd.f32 %v1623_v21, %v1203_v30  ;;  %v1214_v1 = vadd.f32 %v4474_v50, %v6739_v22 }
 0x166   : > { %v1205_v8 = vpop.f32.mrf.mxu1  ;;  %v1639_v48 = vpop.f32.mrf.mxu0 }
 0x167   : > { %v6236_v3 = vadd.f32 %v4522_v20, %v1214_v1  ;;  %v1206_v35 = vadd.f32 %v1205_v8, %v6740_v6 }
 0x168   : > { %v4477_v62 = vpop.f32.mrf.mxu1  ;;  %4764 = vmatmul.mubr.bf16.gmra.mxu1 %v3965_v41  ;;  %v4526_v54 = vpop.f32.mrf.mxu0 }
 0x169   : > { %v6239_v24 = vadd.f32 %v1626_v61, %v1206_v35  ;;  %v1227_v17 = vadd.f32 %v4477_v62, %v6741_v51 }
 0x16a   : > { %v1218_v59 = vpop.f32.mrf.mxu1  ;;  %v1642_v34 = vpop.f32.mrf.mxu0 }
 0x16b   : > { %v6242_v55 = vadd.f32 %v4525_v26, %v1227_v17  ;;  %v1219_v45 = vadd.f32 %v1218_v59, %v6742_v58 }
 0x16c   : > { %v4478_v15 = vpop.f32.mrf.mxu1  ;;  %v4593_v21 = vpop.f32.mrf.mxu0 }
 0x16d   : > { %v6245_v52 = vadd.f32 %v1639_v48, %v1219_v45  ;;  %v1230_v37 = vadd.f32 %v4478_v15, %v6743_v0 }
 0x16e   : > { %v1221_v32 = vpop.f32.mrf.mxu1  ;;  %v2077_v36 = vpop.f32.mrf.mxu0 }
 0x16f   : > { %v6248_v9 = vadd.f32 %v4526_v54, %v1230_v37  ;;  %v1222_v42 = vadd.f32 %v1221_v32, %v6744_v43 }
 0x170   : > { %v4545_v20 = vpop.f32.mrf.mxu1  ;;  %v4594_v23 = vpop.f32.mrf.mxu0 }
 0x171   : > { %v6251_v11 = vadd.f32 %v1642_v34, %v1222_v42  ;;  %v1920_v63 = vadd.f32 %v4545_v20, %v6119_v31 }
 0x172   : > { %v1791_v5 = vpop.f32.mrf.mxu1  ;;  %v2080_v61 = vpop.f32.mrf.mxu0 }
 0x173   : > { %v6254_v56 = vadd.f32 %v4593_v21, %v1920_v63  ;;  %v1918_v30 = vadd.f32 %v1791_v5, %v6122_v29 }
 0x174   : > { %v4546_v50 = vpop.f32.mrf.mxu1  ;;  %v4597_v1 = vpop.f32.mrf.mxu0 }
 0x175   : > { %v6257_v41 = vadd.f32 %v2077_v36, %v1918_v30  ;;  %v1921_v22 = vadd.f32 %v4546_v50, %v6127_v44 }
 0x176   : > { %v1794_v26 = vpop.f32.mrf.mxu1  ;;  %v2093_v35 = vpop.f32.mrf.mxu0 }
 0x177   : > { %v6260_v8 = vadd.f32 %v4594_v23, %v1921_v22  ;;  %v1919_v6 = vadd.f32 %v1794_v26, %v6131_v57 }
 0x178   : > { %v4549_v31 = vpop.f32.mrf.mxu1  ;;  %v4598_v51 = vpop.f32.mrf.mxu0 }
 0x179   : > { %v6263_v48 = vadd.f32 %v2080_v61, %v1919_v6  ;;  %v1924_v62 = vadd.f32 %v4549_v31, %v6135_v2 }
 0x17a   : > { %v1807_v29 = vpop.f32.mrf.mxu1  ;;  %v2096_v59 = vpop.f32.mrf.mxu0 }
 0x17b   : > { %v6266_v17 = vadd.f32 %v4597_v1, %v1924_v62  ;;  %v1922_v54 = vadd.f32 %v1807_v29, %v6138_v10 }
 0x17c   : > { %v4550_v44 = vpop.f32.mrf.mxu1  ;;  %v4601_v34 = vpop.f32.mrf.mxu0 }
 0x17d   : > { %v6269_v58 = vadd.f32 %v2093_v35, %v1922_v54  ;;  %v1925_v45 = vadd.f32 %v4550_v44, %v6143_v38 }
 0x17e   : > { %v1810_v57 = vpop.f32.mrf.mxu1  ;;  %v2109_v37 = vpop.f32.mrf.mxu0 }
 0x17f   : > { %v6272_v15 = vadd.f32 %v4598_v51, %v1925_v45  ;;  %v1923_v0 = vadd.f32 %v1810_v57, %v6147_v60 }
 0x180   : > { %v4553_v2 = vpop.f32.mrf.mxu1  ;;  %v4602_v43 = vpop.f32.mrf.mxu0 }
 0x181   : > { %v6275_v21 = vadd.f32 %v2096_v59, %v1923_v0  ;;  %v1928_v32 = vadd.f32 %v4553_v2, %v6151_v46 }
 0x182   : > { %v1823_v10 = vpop.f32.mrf.mxu1  ;;  %v2112_v20 = vpop.f32.mrf.mxu0 }
 0x183   : > { %v6278_v42 = vadd.f32 %v4601_v34, %v1928_v32  ;;  %v1926_v36 = vadd.f32 %v1823_v10, %v6154_v39 }
 0x184   : > { %v4554_v38 = vpop.f32.mrf.mxu1  ;;  %v4605_v5 = vpop.f32.mrf.mxu0 }
 0x185   : > { %v6281_v63 = vadd.f32 %v2109_v37, %v1926_v36  ;;  %v1929_v23 = vadd.f32 %v4554_v38, %v6159_v25 }
 0x186   : > { %v1826_v60 = vpop.f32.mrf.mxu1  ;;  %v2125_v50 = vpop.f32.mrf.mxu0 }
 0x187   : > { %v6284_v30 = vadd.f32 %v4602_v43, %v1929_v23  ;;  %v1927_v61 = vadd.f32 %v1826_v60, %v6163_v12 }
 0x188   : > { %v4557_v46 = vpop.f32.mrf.mxu1  ;;  %v4606_v26 = vpop.f32.mrf.mxu0 }
 0x189   : > { %v6287_v22 = vadd.f32 %v2112_v20, %v1927_v61  ;;  %v1932_v1 = vadd.f32 %v4557_v46, %v6167_v53 }
 0x18a   : > { %v1839_v39 = vpop.f32.mrf.mxu1  ;;  %v2128_v31 = vpop.f32.mrf.mxu0 }
 0x18b   : > { %v6290_v6 = vadd.f32 %v4605_v5, %v1932_v1  ;;  %v1930_v35 = vadd.f32 %v1839_v39, %v6170_v49 }
 0x18c   : > { %v4558_v25 = vpop.f32.mrf.mxu1  ;;  %v4609_v29 = vpop.f32.mrf.mxu0 }
 0x18d   : > { %v6293_v62 = vadd.f32 %v2125_v50, %v1930_v35  ;;  %v1933_v51 = vadd.f32 %v4558_v25, %v6175_v27 }
 0x18e   : > { %v1842_v12 = vpop.f32.mrf.mxu1  ;;  %v2141_v44 = vpop.f32.mrf.mxu0 }
 0x18f   : > { %v6296_v54 = vadd.f32 %v4606_v26, %v1933_v51  ;;  %v1931_v59 = vadd.f32 %v1842_v12, %v6183_v47 }
 0x190   : > { %v4561_v53 = vpop.f32.mrf.mxu1  ;;  %v4610_v57 = vpop.f32.mrf.mxu0 }
 0x191   : > { %v6299_v45 = vadd.f32 %v2128_v31, %v1931_v59  ;;  %v1936_v34 = vadd.f32 %v4561_v53, %v6187_v14 }
 0x192   : > { %v1855_v49 = vpop.f32.mrf.mxu1  ;;  %v2144_v2 = vpop.f32.mrf.mxu0 }
 0x193   : > { %v6302_v0 = vadd.f32 %v4609_v29, %v1936_v34  ;;  %v1934_v37 = vadd.f32 %v1855_v49, %v6190_v7 }
 0x194   : > { %v4562_v27 = vpop.f32.mrf.mxu1  ;;  %v4613_v10 = vpop.f32.mrf.mxu0 }
 0x195   : > { %v6305_v32 = vadd.f32 %v2141_v44, %v1934_v37  ;;  %v1937_v43 = vadd.f32 %v4562_v27, %v6197_v40 }
 0x196   : > { %v1858_v47 = vpop.f32.mrf.mxu1  ;;  %v2157_v38 = vpop.f32.mrf.mxu0 }
 0x197   : > { %v6308_v36 = vadd.f32 %v4610_v57, %v1937_v43  ;;  %v1935_v20 = vadd.f32 %v1858_v47, %v6201_v4 }
 0x198   : > { %v4565_v14 = vpop.f32.mrf.mxu1  ;;  %v4614_v60 = vpop.f32.mrf.mxu0 }
 0x199   : > { %v6311_v23 = vadd.f32 %v2144_v2, %v1935_v20  ;;  %v1940_v5 = vadd.f32 %v4565_v14, %v6206_v13 }
 0x19a   : > { %v1871_v7 = vpop.f32.mrf.mxu1  ;;  %v2160_v46 = vpop.f32.mrf.mxu0 }
 0x19b   : > { %v6314_v61 = vadd.f32 %v4613_v10, %v1940_v5  ;;  %v1938_v50 = vadd.f32 %v1871_v7, %v6209_v28 }
 0x19c   : > { %v4566_v40 = vpop.f32.mrf.mxu1  ;;  %v4617_v39 = vpop.f32.mrf.mxu0 }
 0x19d   : > { %v6317_v1 = vadd.f32 %v2157_v38, %v1938_v50  ;;  %v1941_v26 = vadd.f32 %v4566_v40, %v6218_v18 }
 0x19e   : > { %v1874_v4 = vpop.f32.mrf.mxu1  ;;  %v2173_v25 = vpop.f32.mrf.mxu0 }
 0x19f   : > { %6745 = vst [vmem:[#allocation23_spill] sm:$0xff] %v6317_v1  ;;  %v6320_v35 = vadd.f32 %v4614_v60, %v1941_v26  ;;  %v1939_v31 = vadd.f32 %v1874_v4, %v6224_v16 }
 0x1a0   : > { %v4569_v13 = vpop.f32.mrf.mxu1  ;;  %v4618_v12 = vpop.f32.mrf.mxu0 }
 0x1a1   : > { %6746 = vst [vmem:[#allocation9_spill] sm:$0xff] %v6320_v35  ;;  %v6323_v51 = vadd.f32 %v2160_v46, %v1939_v31  ;;  %v1944_v29 = vadd.f32 %v4569_v13, %v6230_v33 }
 0x1a2   : > { %v1887_v28 = vpop.f32.mrf.mxu1  ;;  %v2176_v53 = vpop.f32.mrf.mxu0 }
 0x1a3   : > { %6747 = vst [vmem:[#allocation11_spill] sm:$0xff] %v6323_v51  ;;  %v6326_v59 = vadd.f32 %v4617_v39, %v1944_v29  ;;  %v1942_v44 = vadd.f32 %v1887_v28, %v6233_v19 }
 0x1a4   : > { %v4570_v18 = vpop.f32.mrf.mxu1  ;;  %v4621_v49 = vpop.f32.mrf.mxu0 }
 0x1a5   : > { %v6329_v34 = vadd.f32 %v2173_v25, %v1942_v44  ;;  %v1945_v57 = vadd.f32 %v4570_v18, %v6236_v3 }
 0x1a6   : > { %v1890_v16 = vpop.f32.mrf.mxu1  ;;  %v2189_v27 = vpop.f32.mrf.mxu0 }
 0x1a7   : > { %6748 = vst [vmem:[#allocation13_spill] sm:$0xff] %v6329_v34  ;;  %v6332_v37 = vadd.f32 %v4618_v12, %v1945_v57  ;;  %v1943_v2 = vadd.f32 %v1890_v16, %v6239_v24 }
 0x1a8   : > { %v4573_v33 = vpop.f32.mrf.mxu1  ;;  %v4622_v47 = vpop.f32.mrf.mxu0 }
 0x1a9   : > { %6749 = vst [vmem:[#allocation15_spill] sm:$0xff] %v6332_v37  ;;  %v6335_v43 = vadd.f32 %v2176_v53, %v1943_v2  ;;  %v1948_v10 = vadd.f32 %v4573_v33, %v6242_v55 }
 0x1aa   : > { %v1903_v19 = vpop.f32.mrf.mxu1  ;;  %v2192_v14 = vpop.f32.mrf.mxu0 }
 0x1ab   : > { %6750 = vst [vmem:[#allocation17_spill] sm:$0xff] %v6335_v43  ;;  %v6338_v20 = vadd.f32 %v4621_v49, %v1948_v10  ;;  %v1946_v38 = vadd.f32 %v1903_v19, %v6245_v52 }
 0x1ac   : > { %v4574_v3 = vpop.f32.mrf.mxu1  ;;  %v4689_v7 = vpop.f32.mrf.mxu0 }
 0x1ad   : > { %v6341_v5 = vadd.f32 %v2189_v27, %v1946_v38  ;;  %v1949_v60 = vadd.f32 %v4574_v3, %v6248_v9 }
 0x1ae   : > { %v1906_v24 = vpop.f32.mrf.mxu1  ;;  %v2611_v40 = vpop.f32.mrf.mxu0 }
 0x1af   : > { %6751 = vst [vmem:[#allocation22_spill] sm:$0xff] %v6341_v5  ;;  %v6344_v50 = vadd.f32 %v4622_v47, %v1949_v60  ;;  %v1947_v46 = vadd.f32 %v1906_v24, %v6251_v11 }
 0x1b0   : > { %v4641_v55 = vpop.f32.mrf.mxu1  ;;  %v6350_v4 = vpop.f32.mrf.mxu0 }
 0x1b1   : > { %6752 = vst [vmem:[#allocation25_spill] sm:$0xff] %v6344_v50  ;;  %v6347_v26 = vadd.f32 %v2192_v14, %v1947_v46  ;;  %v2476_v39 = vadd.f32 %v4641_v55, %v6254_v56 }
 0x1b2   : > { %v2347_v52 = vpop.f32.mrf.mxu1  ;;  %v6355_v9 = vpop.f32.mrf.mxu0 }
 0x1b3   : > { %6753 = vst [vmem:[#allocation26_spill] sm:$0xff] %v6347_v26  ;;  %v6352_v31 = vadd.f32 %v4689_v7, %v2476_v39  ;;  %v2474_v25 = vadd.f32 %v2347_v52, %v6257_v41 }
 0x1b4   : > { %v6357_v13 = vpop.f32.mrf.mxu1  ;;  %v4693_v11 = vpop.f32.mrf.mxu0 }
 0x1b5   : > { %v6359_v29 = vadd.f32 %v2611_v40, %v2474_v25 }
 0x1b6   : > { %v6361_v12 = vpop.f32.mrf.mxu1  ;;  %v6363_v28 = vpop.f32.mrf.mxu0 }
 0x1b8   : > { %v4645_v44 = vpop.f32.mrf.mxu1  ;;  %v6366_v53 = vpop.f32.mrf.mxu0 }
 0x1b9   : > { %v2480_v56 = vadd.f32 %v4645_v44, %v6266_v17 }
 0x1ba   : > { %v6368_v18 = vpop.f32.mrf.mxu1  ;;  %v6372_v41 = vpop.f32.mrf.mxu0 }
 0x1bb   : > { %v6370_v57 = vadd.f32 %v4693_v11, %v2480_v56 }
 0x1bc   : > { %v6374_v49 = vpop.f32.mrf.mxu1  ;;  %v4697_v16 = vpop.f32.mrf.mxu0 }
 0x1be   : > { %v6376_v2 = vpop.f32.mrf.mxu1  ;;  %v6378_v27 = vpop.f32.mrf.mxu0 }
 0x1c0   : > { %v4649_v33 = vpop.f32.mrf.mxu1  ;;  %v6381_v47 = vpop.f32.mrf.mxu0 }
 0x1c1   : > { %v2484_v10 = vadd.f32 %v4649_v33, %v6278_v42 }
 0x1c2   : > { %v6383_v17 = vpop.f32.mrf.mxu1  ;;  %v6387_v38 = vpop.f32.mrf.mxu0 }
 0x1c3   : > { %v6385_v19 = vadd.f32 %v4697_v16, %v2484_v10 }
 0x1c4   : > { %v6389_v14 = vpop.f32.mrf.mxu1  ;;  %v4701_v3 = vpop.f32.mrf.mxu0 }
 0x1c6   : > { %v6391_v60 = vpop.f32.mrf.mxu1  ;;  %v6393_v7 = vpop.f32.mrf.mxu0 }
 0x1c8   : > { %v4653_v24 = vpop.f32.mrf.mxu1  ;;  %v6396_v40 = vpop.f32.mrf.mxu0 }
 0x1c9   : > { %v2488_v46 = vadd.f32 %v4653_v24, %v6290_v6 }
 0x1ca   : > { %v6398_v42 = vpop.f32.mrf.mxu1  ;;  %v6402_v39 = vpop.f32.mrf.mxu0 }
 0x1cb   : > { %v6400_v55 = vadd.f32 %v4701_v3, %v2488_v46 }
 0x1cc   : > { %v6404_v52 = vpop.f32.mrf.mxu1  ;;  %v4705_v25 = vpop.f32.mrf.mxu0 }
 0x1ce   : > { %v6406_v11 = vpop.f32.mrf.mxu1  ;;  %v6408_v44 = vpop.f32.mrf.mxu0 }
 0x1d0   : > { %v4657_v56 = vpop.f32.mrf.mxu1  ;;  %v6411_v33 = vpop.f32.mrf.mxu0 }
 0x1d1   : > { %v2492_v16 = vadd.f32 %v4657_v56, %v6302_v0 }
 0x1d2   : > { %v6413_v6 = vpop.f32.mrf.mxu1  ;;  %v6417_v3 = vpop.f32.mrf.mxu0 }
 0x1d3   : > { %v6415_v10 = vadd.f32 %v4705_v25, %v2492_v16  ;;  %6754 = vst [vmem:[#allocation8_spill] sm:$0xff] %v6417_v3 }
 0x1d4   : > { %v6419_v24 = vpop.f32.mrf.mxu1  ;;  %v4709_v46 = vpop.f32.mrf.mxu0 }
 0x1d6   : > { %v6421_v26 = vpop.f32.mrf.mxu1  ;;  %v6423_v50 = vpop.f32.mrf.mxu0 }
 0x1d7   : > { %6755 = vst [vmem:[#allocation18_spill] sm:$0xff] %v6423_v50 }
 0x1d8   : > { %v4661_v5 = vpop.f32.mrf.mxu1  ;;  %v6426_v37 = vpop.f32.mrf.mxu0 }
 0x1d9   : > { %v2496_v43 = vadd.f32 %v4661_v5, %v6314_v61  ;;  %6756 = vst [vmem:[#allocation20_spill] sm:$0xff] %v6426_v37 }
 0x1da   : > { %v6428_v0 = vpop.f32.mrf.mxu1  ;;  %v6432_v25 = vpop.f32.mrf.mxu0 }
 0x1db   : > { %v6430_v56 = vadd.f32 %v4709_v46, %v2496_v43  ;;  %6758 = vst [vmem:[#allocation24_spill] sm:$0xff] %v6432_v25 }
 0x1dc   : > { %v6434_v16 = vpop.f32.mrf.mxu1  ;;  %v4713_v34 = vpop.f32.mrf.mxu0 }
 0x1dd   : > { %6757 = vst [vmem:[#allocation21_spill] sm:$0xff] %v6430_v56 }
 0x1de   : > { %v6436_v51 = vpop.f32.mrf.mxu1  ;;  %v6438_v35 = vpop.f32.mrf.mxu0 }
 0x1df   : > { %6759 = vst [vmem:[#allocation10_spill] sm:$0xff] %v6436_v51  ;;  %6760 = vst [vmem:[#allocation12_spill] sm:$0xff] %v6438_v35 }
 0x1e0   : > { %v4665_v1 = vpop.f32.mrf.mxu1  ;;  %v6441_v3 = vpop.f32.mrf.mxu0 }
 0x1e1   : > { %v2500_v50 = vadd.f32 %v4665_v1, %v6326_v59  ;;  %6761 = vst [vmem:[#allocation14_spill] sm:$0xff] %v6441_v3 }
 0x1e2   : > { %v6443_v61 = vpop.f32.mrf.mxu1  ;;  %v6447_v43 = vpop.f32.mrf.mxu0 }
 0x1e3   : > { %6762 = vst [vmem:[#allocation16_spill] sm:$0xff] %v6443_v61  ;;  %v6445_v5 = vadd.f32 %v4713_v34, %v2500_v50  ;;  %6764 = vst [vmem:[#allocation27_spill] sm:$0xff] %v6447_v43 }
 0x1e4   : > { %v6449_v46 = vpop.f32.mrf.mxu1  ;;  %v4717_v25 = vpop.f32.mrf.mxu0 }
 0x1e5   : > { %6763 = vst [vmem:[#allocation19_spill] sm:$0xff] %v6445_v5  ;;  %6765 = vst [vmem:[#allocation28_spill] sm:$0xff] %v6449_v46 }
 0x1e6   : > { %v6451_v56 = vpop.f32.mrf.mxu1  ;;  %v6453_v37 = vpop.f32.mrf.mxu0 }
 0x1e7   : > { %6766 = vst [vmem:[#allocation29_spill] sm:$0xff] %v6451_v56  ;;  %6767 = vst [vmem:[#allocation30_spill] sm:$0xff] %v6453_v37  ;;  %v2477_v37 = vadd.f32 %v6357_v13, %v6260_v8 }
 0x1e8   : > { %v4669_v35 = vpop.f32.mrf.mxu1  ;;  %v6456_v1 = vpop.f32.mrf.mxu0 }
 0x1e9   : > { %v2504_v51 = vadd.f32 %v4669_v35, %v6338_v20  ;;  %6768 = vst [vmem:[#allocation31_spill] sm:$0xff] %v6456_v1  ;;  %v2475_v35 = vadd.f32 %v6361_v12, %v6263_v48  ;;  %v2478_v48 = vadd.f32 %v6368_v18, %v6269_v58  ;;  %v2481_v12 = vadd.f32 %v6374_v49, %v6272_v15 }
 0x1ea   : > { %v6458_v59 = vpop.f32.mrf.mxu1  ;;  %v6462_v34 = vpop.f32.mrf.mxu0 }
 0x1eb   : > { %6769 = vst [vmem:[#allocation32_spill] sm:$0xff] %v6458_v59  ;;  %v6460_v3 = vadd.f32 %v4717_v25, %v2504_v51  ;;  %6771 = vst [vmem:[#allocation34_spill] sm:$0xff] %v6462_v34  ;;  %v2741_v51 = vadd.f32 %v6350_v4, %v2477_v37  ;;  %v2739_v8 = vadd.f32 %v6355_v9, %v2475_v35 }
 0x1ec   : > { %v6464_v50 = vpop.f32.mrf.mxu1  ;;  %v4785_v43 = vpop.f32.mrf.mxu0  ;;  %v2745_v58 = vadd.f32 %v6366_v53, %v2481_v12 }
 0x1ed   : > { %6770 = vst [vmem:[#allocation33_spill] sm:$0xff] %v6460_v3  ;;  %6772 = vst [vmem:[#allocation35_spill] sm:$0xff] %v6464_v50 }
 0x1ee   : > { %v6466_v5 = vpop.f32.mrf.mxu1  ;;  %v3167_v56 = vpop.f32.mrf.mxu0 }
 0x1ef   : > { %6773 = vst [vmem:[#allocation36_spill] sm:$0xff] %v6466_v5 }
 0x1f0   : > { %v4737_v46 = vpop.f32.mrf.mxu1  ;;  %v4786_v20 = vpop.f32.mrf.mxu0 }
 0x1f1   : > { %v3026_v25 = vadd.f32 %v4737_v46, %v6352_v31 }
 0x1f2   : > { %v2897_v1 = vpop.f32.mrf.mxu1  ;;  %v3170_v3 = vpop.f32.mrf.mxu0 }
 0x1f3   : > { %v3024_v34 = vadd.f32 %v2897_v1, %v6359_v29  ;;  %v3296_v61 = vadd.f32 %v4785_v43, %v3026_v25  ;;  %v2479_v29 = vadd.f32 %v6376_v2, %v6275_v21 }
 0x1f4   : > { %v4738_v5 = vpop.f32.mrf.mxu1  ;;  %v4789_v50 = vpop.f32.mrf.mxu0 }
 0x1f5   : > { %v3027_v13 = vadd.f32 %v4738_v5, %v2741_v51  ;;  %v3294_v37 = vadd.f32 %v3167_v56, %v3024_v34  ;;  %v2742_v51 = vadd.f32 %v6363_v28, %v2478_v48  ;;  %v2482_v28 = vadd.f32 %v6383_v17, %v6281_v63 }
 0x1f6   : > { %v2900_v59 = vpop.f32.mrf.mxu1  ;;  %v3183_v46 = vpop.f32.mrf.mxu0  ;;  %v3525_v34 = vmul.f32 %v3296_v61, %v3296_v61 }
 0x1f7   : > { %v3297_v4 = vadd.f32 %v4786_v20, %v3027_v13  ;;  %v3025_v31 = vadd.f32 %v2900_v59, %v2739_v8  ;;  %v3523_v49 = vmul.f32 %v3294_v37, %v3294_v37  ;;  %v2485_v13 = vadd.f32 %v6389_v14, %v6284_v30 }
 0x1f8   : > { %v4741_v1 = vpop.f32.mrf.mxu1  ;;  %v4790_v35 = vpop.f32.mrf.mxu0 }
 0x1f9   : > { %v4080_v9 = vpack.c.bf16 %v3297_v4, %v3296_v61  ;;  %v3295_v5 = vadd.f32 %v3170_v3, %v3025_v31  ;;  %v3030_v18 = vadd.f32 %v4741_v1, %v6370_v57  ;;  %v2743_v3 = vadd.f32 %v6372_v41, %v2479_v29 }
 0x1fa   : > { %v2913_v15 = vpop.f32.mrf.mxu1  ;;  %v3186_v2 = vpop.f32.mrf.mxu0  ;;  %v3526_v48 = vmul.f32 %v3297_v4, %v3297_v4 }
 0x1fb   : > { %4152 = vst [vmem:[%s6489_s11 + $0x8] sm:$0xff] %v4080_v9   ;;  %v4075_v56 = vpack.c.bf16 %v3295_v5, %v3294_v37  ;;  %v3486_v43 = vadd.f32 %v3295_v5, %v3294_v37  ;;  %v3524_v21 = vmul.f32 %v3295_v5, %v3295_v5  ;;  %v3028_v59 = vadd.f32 %v2913_v15, %v2742_v51 }
 0x1fc   : > { %v4742_v53 = vpop.f32.mrf.mxu1  ;;  %v4793_v8 = vpop.f32.mrf.mxu0  ;;  %v3300_v12 = vadd.f32 %v4789_v50, %v3030_v18  ;;  %v2746_v9 = vadd.f32 %v6378_v27, %v2482_v28  ;;  %v2749_v18 = vadd.f32 %v6381_v47, %v2485_v13 }
 0x1fd   : > { %4076 = vst [vmem:[%s6489_s11] sm:$0xff] %v4075_v56   ;;  %v3487_v57 = vadd.f32 %v3486_v43, %v3296_v61  ;;  %v3555_v20 = vadd.f32 %v3524_v21, %v3523_v49  ;;  %v3031_v25 = vadd.f32 %v4742_v53, %v2745_v58  ;;  %v3298_v37 = vadd.f32 %v3183_v46, %v3028_v59 }
 0x1fe   : > { %v2916_v31 = vpop.f32.mrf.mxu1  ;;  %v3199_v17 = vpop.f32.mrf.mxu0  ;;  %v2483_v61 = vadd.f32 %v6391_v60, %v6287_v22  ;;  %v3529_v59 = vmul.f32 %v3300_v12, %v3300_v12 }
 0x1ff   : > { %v3556_v1 = vadd.f32 %v3555_v20, %v3525_v34  ;;  %v3488_v41 = vadd.f32 %v3487_v57, %v3297_v4  ;;  %v3301_v29 = vadd.f32 %v4790_v35, %v3031_v25  ;;  %v3029_v63 = vadd.f32 %v2916_v31, %v2743_v3 }
 0x200   : > { %v4745_v5 = vpop.f32.mrf.mxu1  ;;  %v3527_v58 = vmul.f32 %v3298_v37, %v3298_v37  ;;  %v4794_v14 = vpop.f32.mrf.mxu0  ;;  %v2747_v21 = vadd.f32 %v6387_v38, %v2483_v61  ;;  %v2486_v3 = vadd.f32 %v6398_v42, %v6293_v62 }
 0x201   : > { %v3489_v51 = vadd.f32 %v3488_v41, %v3298_v37  ;;  %v3557_v15 = vadd.f32 %v3556_v1, %v3526_v48  ;;  %v4090_v30 = vpack.c.bf16 %v3301_v29, %v3300_v12  ;;  %v3299_v50 = vadd.f32 %v3186_v2, %v3029_v63 }
 0x202   : > { %v2929_v46 = vpop.f32.mrf.mxu1  ;;  %v3034_v35 = vadd.f32 %v4745_v5, %v6385_v19  ;;  %v3202_v27 = vpop.f32.mrf.mxu0  ;;  %v2489_v2 = vadd.f32 %v6404_v52, %v6296_v54  ;;  %v3530_v38 = vmul.f32 %v3301_v29, %v3301_v29  ;;  %v2750_v42 = vadd.f32 %v6393_v7, %v2486_v3 }
 0x203   : > { %v3558_v4 = vadd.f32 %v3557_v15, %v3527_v58  ;;  %4154 = vst [vmem:[%s6489_s11 + $0x18] sm:$0xff] %v4090_v30   ;;  %v3032_v49 = vadd.f32 %v2929_v46, %v2746_v9  ;;  %v4085_v56 = vpack.c.bf16 %v3299_v50, %v3298_v37  ;;  %v3490_v43 = vadd.f32 %v3489_v51, %v3299_v50 }
 0x204   : > { %v3528_v22 = vmul.f32 %v3299_v50, %v3299_v50  ;;  %v4746_v60 = vpop.f32.mrf.mxu1  ;;  %v4797_v28 = vpop.f32.mrf.mxu0  ;;  %v3304_v20 = vadd.f32 %v4793_v8, %v3034_v35  ;;  %v2487_v54 = vadd.f32 %v6406_v11, %v6299_v45  ;;  %v2753_v41 = vadd.f32 %v6396_v40, %v2489_v2 }
 0x205   : > { %v3035_v47 = vadd.f32 %v4746_v60, %v2749_v18  ;;  %4153 = vst [vmem:[%s6489_s11 + $0x10] sm:$0xff] %v4085_v56   ;;  %v3491_v53 = vadd.f32 %v3490_v43, %v3300_v12  ;;  %v3302_v34 = vadd.f32 %v3199_v17, %v3032_v49  ;;  %v2490_v40 = vadd.f32 %v6413_v6, %v6305_v32 }
 0x206   : > { %v3559_v19 = vadd.f32 %v3558_v4, %v3528_v22  ;;  %v2932_v57 = vpop.f32.mrf.mxu1  ;;  %v3215_v48 = vpop.f32.mrf.mxu0  ;;  %v2751_v11 = vadd.f32 %v6402_v39, %v2487_v54  ;;  %v2493_v30 = vadd.f32 %v6419_v24, %v6308_v36  ;;  %v3533_v46 = vmul.f32 %v3304_v20, %v3304_v20 }
 0x207   : > { %v3305_v25 = vadd.f32 %v4794_v14, %v3035_v47  ;;  %v3033_v13 = vadd.f32 %v2932_v57, %v2747_v21  ;;  %v3492_v31 = vadd.f32 %v3491_v53, %v3301_v29  ;;  %v3531_v8 = vmul.f32 %v3302_v34, %v3302_v34 }
 0x208   : > { %v3560_v37 = vadd.f32 %v3559_v19, %v3529_v59  ;;  %v4749_v62 = vpop.f32.mrf.mxu1  ;;  %v4798_v12 = vpop.f32.mrf.mxu0  ;;  %v2754_v6 = vadd.f32 %v6408_v44, %v2490_v40  ;;  %v2491_v36 = vadd.f32 %v6421_v26, %v6311_v23  ;;  %v2757_v2 = vadd.f32 %v6411_v33, %v2493_v30  ;;  %v6774_v26 = vld [vmem:[#allocation8_spill] sm:$0xff] }
 0x209   : > { %v4100_v52 = vpack.c.bf16 %v3305_v25, %v3304_v20  ;;  %v3303_v1 = vadd.f32 %v3202_v27, %v3033_v13  ;;  %v3493_v63 = vadd.f32 %v3492_v31, %v3302_v34  ;;  %v3038_v29 = vadd.f32 %v4749_v62, %v6400_v55  ;;  %v6780_v40 = vld [vmem:[#allocation20_spill] sm:$0xff] }
 0x20a   : > { %v3561_v17 = vadd.f32 %v3560_v37, %v3530_v38  ;;  %v2945_v9 = vpop.f32.mrf.mxu1  ;;  %v3218_v7 = vpop.f32.mrf.mxu0  ;;  %v3534_v39 = vmul.f32 %v3305_v25, %v3305_v25  ;;  %v6775_v38 = vld [vmem:[#allocation23_spill] sm:$0xff]  ;;  %v6776_v37 = vld [vmem:[#allocation9_spill] sm:$0xff] }
 0x20b   : > { %4156 = vst [vmem:[%s6489_s11 + $0x28] sm:$0xff] %v4100_v52   ;;  %v4095_v61 = vpack.c.bf16 %v3303_v1, %v3302_v34  ;;  %v3532_v5 = vmul.f32 %v3303_v1, %v3303_v1  ;;  %v3036_v51 = vadd.f32 %v2945_v9, %v2750_v42  ;;  %v3494_v15 = vadd.f32 %v3493_v63, %v3303_v1 }
 0x20c   : > { %v3562_v58 = vadd.f32 %v3561_v17, %v3531_v8  ;;  %v4750_v45 = vpop.f32.mrf.mxu1  ;;  %v4801_v50 = vpop.f32.mrf.mxu0  ;;  %v3308_v49 = vadd.f32 %v4797_v28, %v3038_v29  ;;  %v2494_v33 = vadd.f32 %v6428_v0, %v6775_v38  ;;  %v2497_v31 = vadd.f32 %v6434_v16, %v6776_v37  ;;  %v6777_v29 = vld [vmem:[#allocation18_spill] sm:$0xff]  ;;  %v6778_v16 = vld [vmem:[#allocation11_spill] sm:$0xff] }
 0x20d   : > { %4155 = vst [vmem:[%s6489_s11 + $0x20] sm:$0xff] %v4095_v61   ;;  %v3039_v14 = vadd.f32 %v4750_v45, %v2753_v41  ;;  %v3495_v18 = vadd.f32 %v3494_v15, %v3304_v20  ;;  %v3306_v55 = vadd.f32 %v3215_v48, %v3036_v51  ;;  %v2755_v48 = vadd.f32 %v6774_v26, %v2491_v36  ;;  %v6784_v36 = vld [vmem:[#allocation16_spill] sm:$0xff] }
 0x20e   : > { %v3563_v4 = vadd.f32 %v3562_v58, %v3532_v5  ;;  %v2948_v35 = vpop.f32.mrf.mxu1  ;;  %v3231_v43 = vpop.f32.mrf.mxu0  ;;  %v3537_v54 = vmul.f32 %v3308_v49, %v3308_v49  ;;  %v2758_v51 = vadd.f32 %v6777_v29, %v2494_v33  ;;  %v2761_v30 = vadd.f32 %v6780_v40, %v2497_v31  ;;  %v6787_v33 = vld [vmem:[#allocation12_spill] sm:$0xff]  ;;  %v6788_v31 = vld [vmem:[#allocation17_spill] sm:$0xff] }
 0x20f   : > { %v3309_v27 = vadd.f32 %v4798_v12, %v3039_v14  ;;  %v3037_v56 = vadd.f32 %v2948_v35, %v2751_v11  ;;  %v3496_v60 = vadd.f32 %v3495_v18, %v3305_v25  ;;  %v3535_v28 = vmul.f32 %v3306_v55, %v3306_v55  ;;  %v6781_v35 = vld [vmem:[#allocation21_spill] sm:$0xff]  ;;  %v6794_v40 = vld [vmem:[#allocation32_spill] sm:$0xff] }
 0x210   : > { %v3564_v22 = vadd.f32 %v3563_v4, %v3533_v46  ;;  %v4753_v32 = vpop.f32.mrf.mxu1  ;;  %v4802_v3 = vpop.f32.mrf.mxu0 }
 0x211   : > { %v4110_v24 = vpack.c.bf16 %v3309_v27, %v3308_v49  ;;  %v3307_v21 = vadd.f32 %v3218_v7, %v3037_v56  ;;  %v3497_v47 = vadd.f32 %v3496_v60, %v3306_v55  ;;  %v3042_v57 = vadd.f32 %v4753_v32, %v6415_v10  ;;  %v6779_v7 = vld [vmem:[#allocation10_spill] sm:$0xff]  ;;  %v6782_v60 = vld [vmem:[#allocation24_spill] sm:$0xff] }
 0x212   : > { %v3565_v59 = vadd.f32 %v3564_v22, %v3534_v39  ;;  %v2961_v53 = vpop.f32.mrf.mxu1  ;;  %v3234_v44 = vpop.f32.mrf.mxu0  ;;  %v3538_v9 = vmul.f32 %v3309_v27, %v3309_v27  ;;  %v2495_v58 = vadd.f32 %v6779_v7, %v6778_v16 }
 0x213   : > { %4158 = vst [vmem:[%s6489_s11 + $0x38] sm:$0xff] %v4110_v24   ;;  %v4105_v19 = vpack.c.bf16 %v3307_v21, %v3306_v55  ;;  %v3536_v34 = vmul.f32 %v3307_v21, %v3307_v21  ;;  %v3040_v20 = vadd.f32 %v2961_v53, %v2754_v6  ;;  %v3498_v13 = vadd.f32 %v3497_v47, %v3307_v21  ;;  %v6783_v6 = vld [vmem:[#allocation13_spill] sm:$0xff]  ;;  %v6785_v21 = vld [vmem:[#allocation15_spill] sm:$0xff] }
 0x214   : > { %v3566_v25 = vadd.f32 %v3565_v59, %v3535_v28  ;;  %v4754_v23 = vpop.f32.mrf.mxu1  ;;  %v4805_v42 = vpop.f32.mrf.mxu0  ;;  %v3312_v41 = vadd.f32 %v4801_v50, %v3042_v57  ;;  %v2759_v32 = vadd.f32 %v6782_v60, %v2495_v58  ;;  %v2498_v24 = vadd.f32 %v6784_v36, %v6783_v6 }
 0x215   : > { %4157 = vst [vmem:[%s6489_s11 + $0x30] sm:$0xff] %v4105_v19   ;;  %v3043_v62 = vadd.f32 %v4754_v23, %v2757_v2  ;;  %v3499_v52 = vadd.f32 %v3498_v13, %v3308_v49  ;;  %v3310_v10 = vadd.f32 %v3231_v43, %v3040_v20 }
 0x216   : > { %v3567_v1 = vadd.f32 %v3566_v25, %v3536_v34  ;;  %v2964_v12 = vpop.f32.mrf.mxu1  ;;  %v3247_v17 = vpop.f32.mrf.mxu0  ;;  %v3541_v59 = vmul.f32 %v3312_v41, %v3312_v41  ;;  %v2762_v37 = vadd.f32 %v6787_v33, %v2498_v24 }
 0x217   : > { %v3313_v63 = vadd.f32 %v4802_v3, %v3043_v62  ;;  %v3041_v8 = vadd.f32 %v2964_v12, %v2755_v48  ;;  %v3500_v5 = vadd.f32 %v3499_v52, %v3309_v27  ;;  %v3539_v50 = vmul.f32 %v3310_v10, %v3310_v10  ;;  %v6786_v3 = vld [vmem:[#allocation28_spill] sm:$0xff]  ;;  %v6789_v62 = vld [vmem:[#allocation29_spill] sm:$0xff]  ;;  %v6790_v12 = vld [vmem:[#allocation14_spill] sm:$0xff] }
 0x218   : > { %v3568_v61 = vadd.f32 %v3567_v1, %v3537_v54  ;;  %v4757_v0 = vpop.f32.mrf.mxu1  ;;  %v4806_v11 = vpop.f32.mrf.mxu0  ;;  %v2501_v2 = vadd.f32 %v6786_v3, %v6785_v21  ;;  %v2499_v54 = vadd.f32 %v6789_v62, %v6788_v31  ;;  %v6797_v21 = vld [vmem:[#allocation30_spill] sm:$0xff] }
 0x219   : > { %v4120_v15 = vpack.c.bf16 %v3313_v63, %v3312_v41  ;;  %v3311_v45 = vadd.f32 %v3234_v44, %v3041_v8  ;;  %v3501_v14 = vadd.f32 %v3500_v5, %v3310_v10  ;;  %v3046_v49 = vadd.f32 %v4757_v0, %v6781_v35 }
 0x21a   : > { %v3569_v46 = vadd.f32 %v3568_v61, %v3538_v9  ;;  %v2977_v18 = vpop.f32.mrf.mxu1  ;;  %v3250_v56 = vpop.f32.mrf.mxu0  ;;  %v3542_v23 = vmul.f32 %v3313_v63, %v3313_v63 }
 0x21b   : > { %4160 = vst [vmem:[%s6489_s11 + $0x48] sm:$0xff] %v4120_v15   ;;  %v4115_v4 = vpack.c.bf16 %v3311_v45, %v3310_v10  ;;  %v3540_v55 = vmul.f32 %v3311_v45, %v3311_v45  ;;  %v3044_v27 = vadd.f32 %v2977_v18, %v2758_v51  ;;  %v3502_v39 = vadd.f32 %v3501_v14, %v3311_v45  ;;  %v6792_v15 = vld [vmem:[#allocation27_spill] sm:$0xff]  ;;  %v6795_v14 = vld [vmem:[#allocation25_spill] sm:$0xff] }
 0x21c   : > { %v3570_v43 = vadd.f32 %v3569_v46, %v3539_v50  ;;  %v4758_v22 = vpop.f32.mrf.mxu1  ;;  %v4809_v28 = vpop.f32.mrf.mxu0  ;;  %v3316_v20 = vadd.f32 %v4805_v42, %v3046_v49  ;;  %v2763_v45 = vadd.f32 %v6792_v15, %v2499_v54  ;;  %v6796_v50 = vld [vmem:[#allocation35_spill] sm:$0xff]  ;;  %v6802_v54 = vld [vmem:[#allocation34_spill] sm:$0xff] }
 0x21d   : > { %4159 = vst [vmem:[%s6489_s11 + $0x40] sm:$0xff] %v4115_v4   ;;  %v3047_v47 = vadd.f32 %v4758_v22, %v2761_v30  ;;  %v3503_v53 = vadd.f32 %v3502_v39, %v3312_v41  ;;  %v3314_v34 = vadd.f32 %v3247_v17, %v3044_v27  ;;  %v2765_v41 = vadd.f32 %v6790_v12, %v2501_v2  ;;  %v6798_v2 = vld [vmem:[#allocation26_spill] sm:$0xff] }
 0x21e   : > { %v3571_v19 = vadd.f32 %v3570_v43, %v3540_v55  ;;  %v2980_v57 = vpop.f32.mrf.mxu1  ;;  %v3263_v13 = vpop.f32.mrf.mxu0  ;;  %v2505_v46 = vadd.f32 %v6796_v50, %v6795_v14  ;;  %v3545_v55 = vmul.f32 %v3316_v20, %v3316_v20 }
 0x21f   : > { %v3317_v44 = vadd.f32 %v4806_v11, %v3047_v47  ;;  %v3045_v25 = vadd.f32 %v2980_v57, %v2759_v32  ;;  %v3504_v48 = vadd.f32 %v3503_v53, %v3313_v63  ;;  %v3543_v42 = vmul.f32 %v3314_v34, %v3314_v34  ;;  %v6791_v63 = vld [vmem:[#allocation19_spill] sm:$0xff]  ;;  %v6793_v11 = vld [vmem:[#allocation22_spill] sm:$0xff]  ;;  %v6799_v47 = vld [vmem:[#allocation36_spill] sm:$0xff] }
 0x220   : > { %v3572_v26 = vadd.f32 %v3571_v19, %v3541_v59  ;;  %v4761_v38 = vpop.f32.mrf.mxu1  ;;  %v4810_v10 = vpop.f32.mrf.mxu0  ;;  %v2502_v30 = vadd.f32 %v6794_v40, %v6793_v11  ;;  %v2503_v59 = vadd.f32 %v6799_v47, %v6798_v2 }
 0x221   : > { %v4130_v52 = vpack.c.bf16 %v3317_v44, %v3316_v20  ;;  %v3315_v1 = vadd.f32 %v3250_v56, %v3045_v25  ;;  %v3505_v8 = vadd.f32 %v3504_v48, %v3314_v34  ;;  %v3050_v0 = vadd.f32 %v4761_v38, %v6791_v63 }
 0x222   : > { %v3573_v17 = vadd.f32 %v3572_v26, %v3542_v23  ;;  %v2993_v9 = vpop.f32.mrf.mxu1  ;;  %v3266_v51 = vpop.f32.mrf.mxu0  ;;  %v3546_v60 = vmul.f32 %v3317_v44, %v3317_v44  ;;  %v2766_v3 = vadd.f32 %v6797_v21, %v2502_v30 }
 0x223   : > { %4162 = vst [vmem:[%s6489_s11 + $0x58] sm:$0xff] %v4130_v52   ;;  %v4125_v61 = vpack.c.bf16 %v3315_v1, %v3314_v34  ;;  %v3544_v5 = vmul.f32 %v3315_v1, %v3315_v1  ;;  %v3048_v29 = vadd.f32 %v2993_v9, %v2762_v37  ;;  %v3506_v7 = vadd.f32 %v3505_v8, %v3315_v1  ;;  %v6800_v34 = vld [vmem:[#allocation31_spill] sm:$0xff] }
 0x224   : > { %v3574_v16 = vadd.f32 %v3573_v17, %v3543_v42  ;;  %v4762_v58 = vpop.f32.mrf.mxu1  ;;  %v4813_v4 = vpop.f32.mrf.mxu0  ;;  %v3320_v43 = vadd.f32 %v4809_v28, %v3050_v0  ;;  %v2769_v57 = vadd.f32 %v6800_v34, %v2505_v46  ;;  %v2767_v52 = vadd.f32 %v6802_v54, %v2503_v59 }
 0x225   : > { %4161 = vst [vmem:[%s6489_s11 + $0x50] sm:$0xff] %v4125_v61   ;;  %v3051_v18 = vadd.f32 %v4762_v58, %v2765_v41  ;;  %v3507_v35 = vadd.f32 %v3506_v7, %v3316_v20  ;;  %v3318_v27 = vadd.f32 %v3263_v13, %v3048_v29 }
 0x226   : > { %v3575_v49 = vadd.f32 %v3574_v16, %v3544_v5  ;;  %v2996_v56 = vpop.f32.mrf.mxu1  ;;  %v3279_v24 = vpop.f32.mrf.mxu0 }
 0x227   : > { %v3321_v39 = vadd.f32 %v4810_v10, %v3051_v18  ;;  %v3049_v22 = vadd.f32 %v2996_v56, %v2763_v45  ;;  %v3508_v6 = vadd.f32 %v3507_v35, %v3317_v44  ;;  %v3547_v28 = vmul.f32 %v3318_v27, %v3318_v27  ;;  %v6801_v44 = vld [vmem:[#allocation33_spill] sm:$0xff] }
 0x228   : > { %v3576_v32 = vadd.f32 %v3575_v49, %v3545_v55  ;;  %v4765_v36 = vpop.f32.mrf.mxu1  ;;  %v4814_v62 = vpop.f32.mrf.mxu0  ;;  %v3549_v10 = vmul.f32 %v3320_v43, %v3320_v43 }
 0x229   : > { %v4140_v53 = vpack.c.bf16 %v3321_v39, %v3320_v43  ;;  %v3319_v19 = vadd.f32 %v3266_v51, %v3049_v22  ;;  %v3509_v20 = vadd.f32 %v3508_v6, %v3318_v27  ;;  %v3054_v48 = vadd.f32 %v4765_v36, %v6801_v44 }
 0x22a   : > { %v3577_v25 = vadd.f32 %v3576_v32, %v3546_v60  ;;  %v3009_v13 = vpop.f32.mrf.mxu1  ;;  %v3550_v5 = vmul.f32 %v3321_v39, %v3321_v39  ;;  %v3282_v29 = vpop.f32.mrf.mxu0 }
 0x22b   : > { %4164 = vst [vmem:[%s6489_s11 + $0x68] sm:$0xff] %v4140_v53   ;;  %v4135_v23 = vpack.c.bf16 %v3319_v19, %v3318_v27  ;;  %v3548_v26 = vmul.f32 %v3319_v19, %v3319_v19  ;;  %v3052_v38 = vadd.f32 %v3009_v13, %v2766_v3  ;;  %v3510_v37 = vadd.f32 %v3509_v20, %v3319_v19 }
 0x22c   : > { %v3578_v33 = vadd.f32 %v3577_v25, %v3547_v28  ;;  %v4766_v31 = vpop.f32.mrf.mxu1  ;;  %v3324_v17 = vadd.f32 %v4813_v4, %v3054_v48 }
 0x22d   : > { %4163 = vst [vmem:[%s6489_s11 + $0x60] sm:$0xff] %v4135_v23   ;;  %v3055_v1 = vadd.f32 %v4766_v31, %v2769_v57  ;;  %v3511_v12 = vadd.f32 %v3510_v37, %v3320_v43  ;;  %v3322_v8 = vadd.f32 %v3279_v24, %v3052_v38 }
 0x22e   : > { %v3579_v41 = vadd.f32 %v3578_v33, %v3548_v26  ;;  %v3012_v42 = vpop.f32.mrf.mxu1  ;;  %v3553_v14 = vmul.f32 %v3324_v17, %v3324_v17 }
 0x22f   : > { %v3325_v9 = vadd.f32 %v4814_v62, %v3055_v1  ;;  %v3053_v61 = vadd.f32 %v3012_v42, %v2767_v52  ;;  %v3512_v0 = vadd.f32 %v3511_v12, %v3321_v39  ;;  %v3551_v58 = vmul.f32 %v3322_v8, %v3322_v8 }
 0x230   : > { %v3580_v63 = vadd.f32 %v3579_v41, %v3549_v10 }
 0x231   : > { %v4150_v51 = vpack.c.bf16 %v3325_v9, %v3324_v17  ;;  %v3323_v16 = vadd.f32 %v3282_v29, %v3053_v61  ;;  %v3513_v7 = vadd.f32 %v3512_v0, %v3322_v8 }
 0x232   : > { %v3581_v15 = vadd.f32 %v3580_v63, %v3550_v5 }
 0x233   : > { %4166 = vst [vmem:[%s6489_s11 + $0x78] sm:$0xff] %v4150_v51   ;;  %v4145_v45 = vpack.c.bf16 %v3323_v16, %v3322_v8  ;;  %v3552_v11 = vmul.f32 %v3323_v16, %v3323_v16  ;;  %v3514_v30 = vadd.f32 %v3513_v7, %v3323_v16 }
 0x234   : > { %v3582_v40 = vadd.f32 %v3581_v15, %v3551_v58 }
 0x235   : > { %4165 = vst [vmem:[%s6489_s11 + $0x70] sm:$0xff] %v4145_v45   ;;  %v3515_v50 = vadd.f32 %v3514_v30, %v3324_v17 }
 0x236   : > { %v3583_v46 = vadd.f32 %v3582_v40, %v3552_v11 }
 0x237   : > { %4990 = shalt.err (!%p4987_p3)
}
 0x238   : > { %s4991_s4 = scalar_lea.hbm %s6571_s25, 2048  ;;  %s4995_s8 = scalar_lea.hbm %s6643_s2, 4096 }
 0x239   : > { %p4992_p4 = scmp.ne.s32.totalorder %s6571_s25, %s4991_s4  ;;  %p4996_p9 = scmp.lt.s32.totalorder %s6571_s25, %s6643_s2 }
 0x23a   : > { %p4997_p10 = scmp.lt.s32.totalorder %s4995_s8, %s4991_s4 }
 0x23b   : > { %p4993_p7 = pnand %p4992_p4, %p5131_p5 }
 0x23c   : > { %p4998_p11 = por %p4997_p10, %p4996_p9 }
 0x23d   : > { %p4994_p8 = pneg %p4993_p7 }
 0x23f   : > { %p4999_p12 = pnand %p4998_p11, %p4994_p8 }
 0x241   : > { %5002 = shalt.err (!%p4999_p12)
}
 0x242   : > { %s5070_s11 = smov 64   ;;  %s5071_s17 = smov 4   ;;  %v3554_v18 = vmul.f32 %v3325_v9, %v3325_v9  ;;  %v3516_v4 = vadd.f32 %v3515_v50, %v3325_v9  ;;  %v3584_v55 = vadd.f32 %v3583_v46, %v3553_v14  ;;  %vm3592_vm6 = vcmask 1040384  }
 0x243   : > { %4832 = dma.vmem_to_hbm [thread:$0]  (%p5131_p5), %s6573_s19, 2048, %s6571_s25, %s3596_s26, %s5070_s11, %s5070_s11, %s5071_s17  }
 0x244   : > { %v3517_v35 = vrot.slane %v3516_v4, 4  ;;  %v3585_v49 = vadd.f32 %v3584_v55, %v3554_v18  ;;  %s3726_s20 = sshll.u32 %s6473_s7, 1  ;;  %s4036_s24 = sshll.u32 %s5114_s16, 5 }
 0x245   : > { %s174_s19 = scalar_lea.vmem [#allocation4], %s3726_s20  ;;  %s6605_s28 = scalar_lea.hbm %s6644_s3, %s4036_s24 }
 0x246   : > { %v3518_v27 = vadd.f32 %v3517_v35, %v3516_v4  ;;  %v3586_v56 = vrot.slane %v3585_v49, 4  ;;  %s3630_s25 = sshll.u32 %s174_s19, 4  ;;  %s3601_s29 = scalar_lea.sflag [#allocation5], %s6473_s7  ;;  %s3631_s25 = int_to_ptr.vmem [resolvable:$true] %s3630_s25 }
 0x247   : > { %s5003_s30 = scalar_lea.vmem %s3631_s25, 32  ;;  %s5072_s16 = smov [#allocation4]  }
 0x248   : > { %v3519_v43 = vrot.slane %v3518_v27, 2  ;;  %v3587_v39 = vadd.f32 %v3586_v56, %v3585_v49  ;;  %p5004_p13 = scmp.ne.s32.totalorder %s3631_s25, %s5003_s30  ;;  %s5007_s4 = sshll.u32 %s5072_s16, 4  ;;  %s5008_s4 = int_to_ptr.vmem [resolvable:$false] %s5007_s4 }
 0x249   : > { %s5009_s5 = scalar_lea.vmem %s5008_s4, 64  ;;  %p5010_p2 = scmp.lt.s32.totalorder %s3631_s25, %s5008_s4 }
 0x24a   : > { %v3520_v22 = vadd.f32 %v3519_v43, %v3518_v27  ;;  %v3588_v60 = vrot.slane %v3587_v39, 2  ;;  %p5005_p0 = pnand %p5004_p13, %p5131_p5  ;;  %p5011_p3 = scmp.lt.s32.totalorder %s5009_s5, %s5003_s30 }
 0x24c   : > { %v3521_v32 = vrot.slane %v3520_v22, 1  ;;  %v3589_v6 = vadd.f32 %v3588_v60, %v3587_v39  ;;  %p5006_p1 = pneg %p5005_p0  ;;  %p5012_p4 = por %p5011_p3, %p5010_p2 }
 0x24e   : > { %v3590_v36 = vrot.slane %v3589_v6, 1  ;;  %v3522_v24 = vadd.f32 %v3521_v32, %v3520_v22  ;;  %p5013_p7 = pnand %p5012_p4, %p5006_p1 }
 0x250   : > { %v3591_v21 = vadd.f32 %v3590_v36, %v3589_v6 }
 0x252   : > { %v3593_v3 = vsel %vm3592_vm6, %v3522_v24, %v3591_v21 }
 0x253   : > { %3594 = vst [vmem:[%s174_s19] sm:$0x3] %v3593_v3 }
 0x254   : > { %5016 = shalt.err (!%p5013_p7)
}
 0x255   : > { %s5017_s6 = scalar_lea.hbm %s6605_s28, 32  ;;  %s5021_s9 = scalar_lea.hbm %s6644_s3, 64 }
 0x256   : > { %p5018_p8 = scmp.ne.s32.totalorder %s6605_s28, %s5017_s6  ;;  %p5022_p11 = scmp.lt.s32.totalorder %s6605_s28, %s6644_s3 }
 0x257   : > { %p5023_p12 = scmp.lt.s32.totalorder %s5021_s9, %s5017_s6 }
 0x258   : > { %p5019_p9 = pnand %p5018_p8, %p5131_p5 }
 0x259   : > { %p5024_p13 = por %p5023_p12, %p5022_p11 }
 0x25a   : > { %p5020_p10 = pneg %p5019_p9 }
 0x25c   : > { %p5025_p0 = pnand %p5024_p13, %p5020_p10 }
 0x25e   : > { %5028 = shalt.err (!%p5025_p0)
}
 0x25f   : > { %4833 = dma.vmem_to_hbm [thread:$0]  (%p5131_p5), %s3631_s25, 32, %s6605_s28, %s3601_s29  }
 0x260 PF: > { %p4843_p1 = scmp.ge.s32.totalorder %s5067_s15, 2  ;;  %s3642_s17 = sand.u32 1, %s5055_s12  }
 0x261   : > { %s3643_s20 = scalar_lea.sflag [#allocation3], %s3642_s17 }
 0x262   : > { %p4837_p2 = pnand %p4843_p1, %p5135_p6 }
 0x264   : > { %p4838_p3 = pneg %p4837_p2 }
 0x266   : > { %5046 = dma.done.wait (%p4838_p3), %s3643_s20, 2048  }
 0x267   : > { %5048 = vsyncadd (%p4838_p3), %s3643_s20, 4294965248  ;;  %s3652_s24 = scalar_lea.sflag [#allocation5], %s3642_s17 }
 0x268   : > { %5050 = dma.done.wait (%p4838_p3), %s3652_s24, 32  }
 0x269   : > { %5052 = vsyncadd (%p4838_p3), %s3652_s24, 4294967264  ;;  %p17_p5 = scmp.ge.s32.totalorder %s5118_s18, 4   ;;  %s6803_s12 = smov %s5059_s13 }
 0x26a   : > { %s6804_s13 = smov %s5063_s14  ;;  %s6805_s14 = smov %s5129_s21 }
 0x26b   : > { %s6806_s15 = smov %s5118_s18  ;;  %19 = sbr.rel (!%p17_p5) target bundleno = 5 (0x5), region = 88 }
 0x270   :  { %3657 = vsyncpa [#allocation3], 1 }
 0x271   :  { %3659 = vsyncpa [#allocation3 + $0x1], 1 }
 0x272   :  { %3660 = vsyncpa [#allocation5], 1 }
 0x273   :  { %3662 = vsyncpa [#allocation5 + $0x1], 1 }

</bundles_post_ra>
